<compile_context>
chip_gen: v7x
topology: tpu7x:2x2x1
jax: 0.10.0
libtpu: 0.0.40
codegen_flags: <defaults>
</compile_context>

<pallas_src>
import jax
import jax.numpy as jnp
from jax.experimental import pallas as pl
from jax.experimental.pallas import tpu as pltpu


def link_predictor_kernel(x_ref, w1_ref, b1_ref, w2_ref, b2_ref,
                          w3r_ref, b3_ref, out_ref):
    C = w1_ref.shape[0]

    # single concatenated [tile_b, 2C] bf16 block; upcast before any VPU math
    xc = x_ref[...].astype(jnp.float32)
    x = xc[:, :C] * xc[:, C:]                       # hadamard of x_i and x_j

    # hidden layer 1: linear + relu
    h = jnp.dot(x, w1_ref[...], preferred_element_type=jnp.float32) + b1_ref[...]
    h = jnp.maximum(h, 0.0)
    # TODO(synk): F.dropout(p, training=True) not implemented; eval-mode
    # forward (dropout == identity) is reproduced here.

    # hidden layer 2: linear + relu
    h = jnp.dot(h, w2_ref[...], preferred_element_type=jnp.float32) + b2_ref[...]
    h = jnp.maximum(h, 0.0)

    # output layer (out_channels == 1), computed transposed so the result is a
    # lane-dense (1, tile_b) row instead of a (tile_b, 1) column:
    #   o[0, r] = sum_h w3[h] * hidden[r, h]
    o = jax.lax.dot_general(w3r_ref[...], h,
                            dimension_numbers=(((1,), (1,)), ((), ())),
                            preferred_element_type=jnp.float32)
    o = o + b3_ref[...]                              # (1, 1) broadcast over lanes
    out_ref[...] = jax.nn.sigmoid(o).astype(out_ref.dtype)[None]


def link_predictor(x_i, x_j, params, *, tile_b=512):
    """params = (w1, b1, w2, b2, w3, b3); weights are [in, out], biases [1, out]."""
    w1, b1, w2, b2, w3, b3 = params
    N, C = x_i.shape
    H = w1.shape[1]
    O = w3.shape[1]
    assert O == 1, "LinkPredictor output layer has out_channels == 1"

    num_tiles = int(pl.cdiv(N, tile_b))
    n_pad = num_tiles * tile_b

    # bf16 in HBM halves the input DMA bytes (kernel upcasts to f32);
    # concatenating x_i/x_j gives one DMA stream and a denser lane layout.
    x_cat = jnp.concatenate([x_i, x_j], axis=1).astype(jnp.bfloat16)
    if n_pad != N:
        x_cat = jnp.pad(x_cat, ((0, n_pad - N), (0, 0)))

    w3_row = w3.reshape(H, 1).T          # (1, H) transposed final weight
    b3_sc = b3.reshape(1, 1)

    cost = pl.CostEstimate(
        flops=n_pad * (C + 2 * C * H + 2 * H * H + 2 * H),
        transcendentals=n_pad,
        bytes_accessed=(2 * n_pad * 2 * C                      # bf16 inputs
                        + 4 * (w1.size + b1.size + w2.size
                               + b2.size + w3.size + b3.size)  # f32 weights
                        + 4 * n_pad),                          # f32 output
    )

    resident = lambda shape: pl.BlockSpec(shape, lambda i: (0, 0))

    out = pl.pallas_call(
        link_predictor_kernel,
        out_shape=jax.ShapeDtypeStruct((num_tiles, 1, tile_b), jnp.float32),
        grid_spec=pltpu.PrefetchScalarGridSpec(
            num_scalar_prefetch=0,
            grid=(num_tiles,),
            in_specs=[
                pl.BlockSpec((tile_b, 2 * C), lambda i: (i, 0)),  # [x_i | x_j] tile
                resident((C, H)), resident((1, H)),               # layer 1
                resident((H, H)), resident((1, H)),               # layer 2
                resident((1, H)), resident((1, 1)),               # layer 3 (transposed)
            ],
            out_specs=pl.BlockSpec((1, 1, tile_b), lambda i: (i, 0, 0)),
        ),
        compiler_params=pltpu.CompilerParams(
            dimension_semantics=("parallel",)),   # v7x: shard tiles over 2 TCs
        cost_estimate=cost,
    )(x_cat, w1, b1, w2, b2, w3_row, b3_sc)

    # (num_tiles, 1, tile_b) lane-dense slab -> (N, 1) column (drop padding)
    return out.reshape(n_pad, 1)[:N]


def init_params(key, in_channels, hidden_channels, out_channels):
    """Deterministic init matching the module's layer shapes (num_layers=3)."""
    ks = jax.random.split(key, 6)

    def lin(kw, kb, fan_in, fan_out):
        # PyTorch Linear default: U(-1/sqrt(fan_in), 1/sqrt(fan_in))
        bound = 1.0 / jnp.sqrt(jnp.float32(fan_in))
        w = jax.random.uniform(kw, (fan_in, fan_out), jnp.float32, -bound, bound)
        b = jax.random.uniform(kb, (1, fan_out), jnp.float32, -bound, bound)
        return w, b

    w1, b1 = lin(ks[0], ks[1], in_channels, hidden_channels)
    w2, b2 = lin(ks[2], ks[3], hidden_channels, hidden_channels)
    w3, b3 = lin(ks[4], ks[5], hidden_channels, out_channels)
    return (w1, b1, w2, b2, w3, b3)


if __name__ == "__main__":
    # small shapes consistent with the module: num_layers=3, out_channels=1
    # N is deliberately not a multiple of tile_b to exercise the ragged path.
    N, C, H, O = 1000, 32, 32, 1
    key = jax.random.PRNGKey(0)
    k_xi, k_xj, k_p = jax.random.split(key, 3)

    x_i = jax.random.normal(k_xi, (N, C), jnp.float32)
    x_j = jax.random.normal(k_xj, (N, C), jnp.float32)
    params = init_params(k_p, C, H, O)

    out = link_predictor(x_i, x_j, params, tile_b=512)
    out = jax.block_until_ready(out)

    # pure-JAX reference (same bf16 input quantization the kernel uses)
    w1, b1, w2, b2, w3, b3 = params
    xi_q = x_i.astype(jnp.bfloat16).astype(jnp.float32)
    xj_q = x_j.astype(jnp.bfloat16).astype(jnp.float32)
    x = xi_q * xj_q
    x = jnp.maximum(x @ w1 + b1, 0.0)
    x = jnp.maximum(x @ w2 + b2, 0.0)
    ref = jax.nn.sigmoid(x @ w3 + b3)

    assert out.shape == (N, O)
    assert jnp.allclose(out, ref, atol=1e-4), "mismatch vs reference"

    print("KERNEL_OK")
</pallas_src>

<mosaic_0001>
module attributes {stable_mosaic.version = 11 : i64} {
  func.func @link_predictor_kernel(%arg0: i32, %arg1: memref<512x64xbf16, #tpu.memory_space<vmem>>, %arg2: memref<32x32xf32, #tpu.memory_space<vmem>>, %arg3: memref<1x32xf32, #tpu.memory_space<vmem>>, %arg4: memref<32x32xf32, #tpu.memory_space<vmem>>, %arg5: memref<1x32xf32, #tpu.memory_space<vmem>>, %arg6: memref<1x32xf32, #tpu.memory_space<vmem>>, %arg7: memref<1x1xf32, #tpu.memory_space<vmem>>, %arg8: memref<1x1x512xf32, #tpu.memory_space<vmem>>) attributes {dimension_semantics = [#tpu.dimension_semantics<parallel>], iteration_bounds = array<i64: 2>, scalar_prefetch = 0 : i64, scratch_operands = 0 : i64, tpu.core_type = #tpu.core_type<tc>, window_params = [{transform_indices = @transform_0, window_bounds = array<i64: 512, 64>}, {pipeline_mode = #tpu.pipeline_mode<synchronous>, transform_indices = @transform_1, window_bounds = array<i64: 32, 32>}, {pipeline_mode = #tpu.pipeline_mode<synchronous>, transform_indices = @transform_2, window_bounds = array<i64: 1, 32>}, {pipeline_mode = #tpu.pipeline_mode<synchronous>, transform_indices = @transform_3, window_bounds = array<i64: 32, 32>}, {pipeline_mode = #tpu.pipeline_mode<synchronous>, transform_indices = @transform_4, window_bounds = array<i64: 1, 32>}, {pipeline_mode = #tpu.pipeline_mode<synchronous>, transform_indices = @transform_5, window_bounds = array<i64: 1, 32>}, {pipeline_mode = #tpu.pipeline_mode<synchronous>, transform_indices = @transform_6, window_bounds = array<i64: 1, 1>}, {transform_indices = @transform_7, window_bounds = array<i64: 1, 1, 512>}]} {
    %c0 = arith.constant 0 : index
    %c0_0 = arith.constant 0 : index
    %0 = vector.load %arg1[%c0, %c0_0] : memref<512x64xbf16, #tpu.memory_space<vmem>>, vector<512x64xbf16>
    %1 = arith.extf %0 : vector<512x64xbf16> to vector<512x64xf32>
    %2 = vector.extract_strided_slice %1 {offsets = [0, 0], sizes = [512, 32], strides = [1, 1]} : vector<512x64xf32> to vector<512x32xf32>
    %3 = vector.extract_strided_slice %1 {offsets = [0, 32], sizes = [512, 32], strides = [1, 1]} : vector<512x64xf32> to vector<512x32xf32>
    %4 = arith.mulf %2, %3 : vector<512x32xf32>
    %c0_1 = arith.constant 0 : index
    %c0_2 = arith.constant 0 : index
    %5 = vector.load %arg2[%c0_1, %c0_2] : memref<32x32xf32, #tpu.memory_space<vmem>>, vector<32x32xf32>
    %cst = arith.constant dense<0.000000e+00> : vector<512x32xf32>
    %6 = tpu.matmul %4, %5, %cst {dimension_numbers = #tpu.dot_dimension_numbers<[1], [0], [0], [1], [0, 0, 1, 1], [], []>} : vector<512x32xf32>, vector<32x32xf32>, vector<512x32xf32> -> vector<512x32xf32>
    %c0_3 = arith.constant 0 : index
    %c0_4 = arith.constant 0 : index
    %7 = vector.load %arg3[%c0_3, %c0_4] : memref<1x32xf32, #tpu.memory_space<vmem>>, vector<1x32xf32>
    %8 = vector.broadcast %7 : vector<1x32xf32> to vector<512x32xf32>
    %9 = arith.addf %6, %8 : vector<512x32xf32>
    %cst_5 = arith.constant 0.000000e+00 : f32
    %10 = vector.broadcast %cst_5 : f32 to vector<512x32xf32>
    %11 = arith.maximumf %9, %10 : vector<512x32xf32>
    %c0_6 = arith.constant 0 : index
    %c0_7 = arith.constant 0 : index
    %12 = vector.load %arg4[%c0_6, %c0_7] : memref<32x32xf32, #tpu.memory_space<vmem>>, vector<32x32xf32>
    %cst_8 = arith.constant dense<0.000000e+00> : vector<512x32xf32>
    %13 = tpu.matmul %11, %12, %cst_8 {dimension_numbers = #tpu.dot_dimension_numbers<[1], [0], [0], [1], [0, 0, 1, 1], [], []>} : vector<512x32xf32>, vector<32x32xf32>, vector<512x32xf32> -> vector<512x32xf32>
    %c0_9 = arith.constant 0 : index
    %c0_10 = arith.constant 0 : index
    %14 = vector.load %arg5[%c0_9, %c0_10] : memref<1x32xf32, #tpu.memory_space<vmem>>, vector<1x32xf32>
    %15 = vector.broadcast %14 : vector<1x32xf32> to vector<512x32xf32>
    %16 = arith.addf %13, %15 : vector<512x32xf32>
    %cst_11 = arith.constant 0.000000e+00 : f32
    %17 = vector.broadcast %cst_11 : f32 to vector<512x32xf32>
    %18 = arith.maximumf %16, %17 : vector<512x32xf32>
    %c0_12 = arith.constant 0 : index
    %c0_13 = arith.constant 0 : index
    %19 = vector.load %arg6[%c0_12, %c0_13] : memref<1x32xf32, #tpu.memory_space<vmem>>, vector<1x32xf32>
    %cst_14 = arith.constant dense<0.000000e+00> : vector<1x512xf32>
    %20 = tpu.matmul %19, %18, %cst_14 {dimension_numbers = #tpu.dot_dimension_numbers<[1], [1], [0], [0], [0, 0, 1, 0], [], []>} : vector<1x32xf32>, vector<512x32xf32>, vector<1x512xf32> -> vector<1x512xf32>
    %c0_15 = arith.constant 0 : index
    %c0_16 = arith.constant 0 : index
    %21 = vector.load %arg7[%c0_15, %c0_16] : memref<1x1xf32, #tpu.memory_space<vmem>>, vector<1x1xf32>
    %22 = vector.broadcast %21 : vector<1x1xf32> to vector<1x512xf32>
    %23 = arith.addf %20, %22 : vector<1x512xf32>
    %24 = arith.negf %23 : vector<1x512xf32>
    %25 = math.exp %24 : vector<1x512xf32>
    %cst_17 = arith.constant 1.000000e+00 : f32
    %26 = vector.broadcast %cst_17 : f32 to vector<1x512xf32>
    %27 = arith.addf %26, %25 : vector<1x512xf32>
    %28 = arith.divf %26, %27 : vector<1x512xf32>
    %29 = vector.shape_cast %28 : vector<1x512xf32> to vector<1x1x512xf32>
    %c0_18 = arith.constant 0 : index
    %c0_19 = arith.constant 0 : index
    %c0_20 = arith.constant 0 : index
    %30 = vector.load %arg8[%c0_18, %c0_19, %c0_20] : memref<1x1x512xf32, #tpu.memory_space<vmem>>, vector<1x1x512xf32>
    tpu.vector_store %arg8[%c0_18, %c0_19, %c0_20], %29 {strides = array<i32>} : memref<1x1x512xf32, #tpu.memory_space<vmem>>, vector<1x1x512xf32>,
    return
  }
  func.func @transform_0(%arg0: i32) -> (i32, i32) {
    %c0_i32 = arith.constant 0 : i32
    %c0_i32_0 = arith.constant 0 : i32
    return %arg0, %c0_i32 : i32, i32
  }
  func.func @transform_1(%arg0: i32) -> (i32, i32) {
    %c0_i32 = arith.constant 0 : i32
    %c0_i32_0 = arith.constant 0 : i32
    %c0_i32_1 = arith.constant 0 : i32
    return %c0_i32, %c0_i32_0 : i32, i32
  }
  func.func @transform_2(%arg0: i32) -> (i32, i32) {
    %c0_i32 = arith.constant 0 : i32
    %c0_i32_0 = arith.constant 0 : i32
    %c0_i32_1 = arith.constant 0 : i32
    return %c0_i32, %c0_i32_0 : i32, i32
  }
  func.func @transform_3(%arg0: i32) -> (i32, i32) {
    %c0_i32 = arith.constant 0 : i32
    %c0_i32_0 = arith.constant 0 : i32
    %c0_i32_1 = arith.constant 0 : i32
    return %c0_i32, %c0_i32_0 : i32, i32
  }
  func.func @transform_4(%arg0: i32) -> (i32, i32) {
    %c0_i32 = arith.constant 0 : i32
    %c0_i32_0 = arith.constant 0 : i32
    %c0_i32_1 = arith.constant 0 : i32
    return %c0_i32, %c0_i32_0 : i32, i32
  }
  func.func @transform_5(%arg0: i32) -> (i32, i32) {
    %c0_i32 = arith.constant 0 : i32
    %c0_i32_0 = arith.constant 0 : i32
    %c0_i32_1 = arith.constant 0 : i32
    return %c0_i32, %c0_i32_0 : i32, i32
  }
  func.func @transform_6(%arg0: i32) -> (i32, i32) {
    %c0_i32 = arith.constant 0 : i32
    %c0_i32_0 = arith.constant 0 : i32
    %c0_i32_1 = arith.constant 0 : i32
    return %c0_i32, %c0_i32_0 : i32, i32
  }
  func.func @transform_7(%arg0: i32) -> (i32, i32, i32) {
    %c0_i32 = arith.constant 0 : i32
    %c0_i32_0 = arith.constant 0 : i32
    %c0_i32_1 = arith.constant 0 : i32
    return %arg0, %c0_i32, %c0_i32_0 : i32, i32, i32
  }
}

</mosaic_0001>

<bundles_post_ra>
// kernel: tpu_custom_call.1
= control target key start
LH: loop header
LB: loop body
LE: loop exit
PB: predicated region body
PF: predicated region fallthrough
CT: control target
= control target key end

     0   :  { %s4710_s0 = inlined_call_operand.vmem [shape: bf16[1024,64], index: 0, kind: input, shape index: {}]   ;;  %s4711_s1 = inlined_call_operand.vmem [shape: f32[32,32], index: 1, kind: input, shape index: {}]   ;;  %s4712_s2 = inlined_call_operand.vmem [shape: f32[1,32], index: 2, kind: input, shape index: {}]   ;;  %s4713_s3 = inlined_call_operand.vmem [shape: f32[32,32], index: 3, kind: input, shape index: {}]   ;;  %s4714_s4 = inlined_call_operand.vmem [shape: f32[1,32], index: 4, kind: input, shape index: {}]   ;;  %s4715_s5 = inlined_call_operand.vmem [shape: f32[1,32], index: 5, kind: input, shape index: {}]   ;;  %s4716_s6 = inlined_call_operand.<no memory space> [shape: f32[1,1], index: 6, kind: input, shape index: {}]   ;;  %s4717_s7 = inlined_call_operand.hbm [shape: f32[2,1,512], index: 7, kind: output, shape index: {}]  }
   0x1   :  { %v12_v0 = vstv %s4716_s6 }
   0x2   :  { %13 = vst [vmem:[#allocation2] sm:$0x1] %v12_v0 }
   0x3   :  { %14 = vsyncpa [#allocation4], 0 }
   0x4   :  { %16 = vsyncpa [#allocation4 + $0x1], 0  ;;  %s3740_s26 = smov 0   ;;  %s3742_s27 = smov 0  }
   0x5   :  { %s3744_s28 = smov 0   ;;  %s3746_s29 = smov 0  }
   0x6 LB: > { %s2513_s6 = sadd.s32 4294967295, %s3691_s29   ;;  %s2514_s30 = sadd.s32 4294967294, %s3691_s29   ;;  %s3691_s29 = sphi %s3746_s29, %s4819_s29   ;;  %s3687_s28 = sphi %s3744_s28, %s4818_s28   ;;  %s3683_s27 = sphi %s3742_s27, %s4817_s27   ;;  %s3679_s26 = sphi %s3740_s26, %s4816_s26  }
   0x7   : > { %s3763_s8 = sadd.s32 1, %s3691_s29   ;;  %s181_s9 = sadd.s32 1, %s3687_s28 }
   0x8   : > { %s178_s10 = ssub.s32 %s3691_s29, %s3763_s8  ;;  %p191_p0 = scmp.ne.s32.totalorder %s3687_s28, %s3683_s27 }
   0x9   : > { %p179_p1 = scmp.eq.s32.totalorder %s178_s10, 0  ;;  %p192_p2 = scmp.eq.s32.totalorder %s2513_s6, 1 }
   0xa   : > { %p197_p3 = scmp.ne.s32.totalorder %s3683_s27, %s3679_s26  ;;  %p198_p4 = scmp.eq.s32.totalorder %s2514_s30, 1 }
   0xb   : > { %s3773_s11 = scalar_select %p179_p1, %s3687_s28, %s181_s9  }
   0xc   : > { %p3775_p5 = por %p192_p2, %p191_p0  ;;  %p3779_p6 = por %p198_p4, %p197_p3 }
   0xd   : > { %p2517_p7 = scmp.ge.s32.totalorder %s3691_s29, 1  ;;  %p243_p8 = scmp.lt.s32.totalorder %s3691_s29, 3 }
   0xf   : > { %p244_p9 = pnand %p2517_p7, %p243_p8 }
  0x10   : > { %s3785_s14 = sshll.u32 (!%p244_p9), %s2513_s6, 6  ;;  %v729_v1 = vld [vmem:[%s4711_s1] sm:$0xff] (!%p244_p9)  ;;  %v730_v2 = vld [vmem:[%s4711_s1 + $0x8] sm:$0xff] (!%p244_p9)  ;;  %v731_v3 = vld [vmem:[%s4711_s1 + $0x10] sm:$0xff] (!%p244_p9)  ;;  %s3693_s9 = smov (!%p244_p9), 96   ;;  %vm740_vm0 = vcmask (!%p244_p9), 261120  }
  0x11   : > { %247 = sbr.rel (%p244_p9) target bundleno = 1013 (0x3f5), region = 48  ;;  %p276_p10 = scmp.lt.s32.totalorder (!%p244_p9), %s3785_s14, 127  ;;  %v3298_v4 = vpack.c.bf16 (!%p244_p9), %v730_v2, %v729_v1  ;;  %v732_v5 = vld [vmem:[%s4711_s1 + $0x18] sm:$0xff] (!%p244_p9)  ;;  %vm4514_vm1 = vmpackc.low (!%p244_p9), %vm740_vm0, %vm740_vm0 }
  0x12   : > { %v3302_v6 = vpack.c.bf16 (!%p244_p9), %v732_v5, %v731_v3  ;;  %s4668_s19 = scalar_lea.hbm (!%p244_p9), %s4717_s7, %s3785_s14  ;;  %s3696_s22 = smov (!%p244_p9), [#allocation3]  }
  0x13   : > { %3299 = vmatprep.subr.bf16.mxu0 (!%p244_p9), %v3298_v4 }
  0x14   : > { %3301 = vmatpush3.bf16.msra.mxu0 (!%p244_p9), %v3298_v4 }
  0x15   : > { %3303 = vmatprep.subr.bf16.mxu0 (!%p244_p9), %v3302_v6 }
  0x18   : > { %s277_s23 = scalar_select %p276_p10, %s3785_s14, 127  ;;  %3305 = vmatpush3.bf16.msra.mxu0 %v3302_v6 }
  0x1a   : > { %s2520_s24 = sshll.u32 %s277_s23, 2  ;;  %s3633_s23 = sshll.u32 %s3696_s22, 4  ;;  %s3634_s23 = int_to_ptr.vmem [resolvable:$false] %s3633_s23 }
  0x1b   : > { %s3804_s30 = scalar_lea.vmem %s4710_s0, %s2520_s24  ;;  %s3635_s24 = scalar_lea.vmem %s3634_s23, 128 }
  0x1c   : > { %v3807_v7 = vld [vmem:[%s3804_s30] sm:$0xff]   ;;  %v3810_v8 = vld [vmem:[%s3804_s30 + $0x8] sm:$0xff]   ;;  %v3813_v9 = vld [vmem:[%s3804_s30 + $0x10] sm:$0xff]  }
  0x1d   : > { %v2729_v10 = vunpack.c.l.bf16 %v3807_v7  ;;  %v2730_v11 = vunpack.c.h.bf16 %v3807_v7  ;;  %v2733_v12 = vunpack.c.l.bf16 %v3810_v8  ;;  %v2734_v13 = vunpack.c.h.bf16 %v3810_v8  ;;  %v3820_v14 = vld [vmem:[%s3804_s30 + $0x18] sm:$0xff]   ;;  %v3827_v19 = vld [vmem:[%s3804_s30 + $0x20] sm:$0xff]   ;;  %v3834_v21 = vld [vmem:[%s3804_s30 + $0x28] sm:$0xff]  }
  0x1e   : > { %v2737_v15 = vunpack.c.l.bf16 %v3813_v9  ;;  %v2738_v16 = vunpack.c.h.bf16 %v3813_v9  ;;  %v2741_v17 = vunpack.c.l.bf16 %v3820_v14  ;;  %v2742_v18 = vunpack.c.h.bf16 %v3820_v14  ;;  %v3855_v29 = vld [vmem:[%s3804_s30 + $0x30] sm:$0xff]   ;;  %v3858_v30 = vld [vmem:[%s3804_s30 + $0x38] sm:$0xff]   ;;  %v3875_v37 = vld [vmem:[%s3804_s30 + $0x40] sm:$0xff]  }
  0x1f   : > { %v3452_v20 = vpack.i.bf16 %v2730_v11, %v2729_v10  ;;  %v3457_v23 = vpack.i.bf16 %v2734_v13, %v2733_v12  ;;  %v2745_v24 = vunpack.c.l.bf16 %v3827_v19  ;;  %v2746_v25 = vunpack.c.h.bf16 %v3827_v19  ;;  %v3878_v38 = vld [vmem:[%s3804_s30 + $0x48] sm:$0xff]   ;;  %v3895_v45 = vld [vmem:[%s3804_s30 + $0x50] sm:$0xff]   ;;  %v3898_v46 = vld [vmem:[%s3804_s30 + $0x58] sm:$0xff]  }
  0x20   : > { %v3462_v22 = vpack.i.bf16 %v2738_v16, %v2737_v15  ;;  %v3467_v26 = vpack.i.bf16 %v2742_v18, %v2741_v17  ;;  %v2749_v27 = vunpack.c.l.bf16 %v3834_v21  ;;  %v2750_v28 = vunpack.c.h.bf16 %v3834_v21  ;;  %v3915_v53 = vld [vmem:[%s3804_s30 + $0x60] sm:$0xff]   ;;  %v3918_v54 = vld [vmem:[%s3804_s30 + $0x68] sm:$0xff]   ;;  %v3935_v61 = vld [vmem:[%s3804_s30 + $0x70] sm:$0xff]  }
  0x21   : > { %3453 = vrot.lane.b32.xlu0 %v3452_v20, %s3693_s9  ;;  %v3472_v31 = vpack.i.bf16 %v2746_v25, %v2745_v24  ;;  %v2753_v32 = vunpack.c.l.bf16 %v3855_v29  ;;  %v2754_v33 = vunpack.c.h.bf16 %v3855_v29  ;;  %v2757_v35 = vunpack.c.l.bf16 %v3858_v30  ;;  %v3938_v62 = vld [vmem:[%s3804_s30 + $0x78] sm:$0xff]   ;;  %v3955_v5 = vld [vmem:[%s3804_s30 + $0x80] sm:$0xff]   ;;  %v3958_v6 = vld [vmem:[%s3804_s30 + $0x88] sm:$0xff]  }
  0x22   : > { %3463 = vrot.lane.b32.xlu1 %v3462_v22, %s3693_s9  ;;  %v3477_v34 = vpack.i.bf16 %v2750_v28, %v2749_v27  ;;  %v2758_v36 = vunpack.c.h.bf16 %v3858_v30  ;;  %v2761_v40 = vunpack.c.l.bf16 %v3875_v37  ;;  %v4764_v41 = vunpack.c.h.bf16 %v3875_v37 }
  0x23   : > { %v3482_v39 = vpack.i.bf16 %v2754_v33, %v2753_v32  ;;  %v4763_v43 = vunpack.c.l.bf16 %v3878_v38  ;;  %v4762_v44 = vunpack.c.h.bf16 %v3878_v38  ;;  %v4761_v48 = vunpack.c.l.bf16 %v3895_v45 }
  0x24   : > { %v3487_v42 = vpack.i.bf16 %v2758_v36, %v2757_v35  ;;  %v3492_v47 = vpack.i.bf16 %v4764_v41, %v2761_v40  ;;  %v4748_v49 = vunpack.c.h.bf16 %v3895_v45  ;;  %v4747_v51 = vunpack.c.l.bf16 %v3898_v46 }
  0x25   : > { %3458 = vrot.lane.b32.xlu0 %v3457_v23, %s3693_s9  ;;  %v3497_v50 = vpack.i.bf16 %v4762_v44, %v4763_v43  ;;  %v4744_v52 = vunpack.c.h.bf16 %v3898_v46  ;;  %v4741_v56 = vunpack.c.l.bf16 %v3915_v53  ;;  %v4740_v57 = vunpack.c.h.bf16 %v3915_v53 }
  0x26   : > { %3468 = vrot.lane.b32.xlu1 %v3467_v26, %s3693_s9  ;;  %v3502_v55 = vpack.i.bf16 %v4748_v49, %v4761_v48  ;;  %v4735_v59 = vunpack.c.l.bf16 %v3918_v54  ;;  %v4734_v60 = vunpack.c.h.bf16 %v3918_v54  ;;  %v4729_v0 = vunpack.c.l.bf16 %v3935_v61  ;;  %v4098_v49 = vld [vmem:[%s3804_s30 + $0xf8] sm:$0xff]  }
  0x27   : > { %v3507_v58 = vpack.i.bf16 %v4744_v52, %v4747_v51  ;;  %v3512_v63 = vpack.i.bf16 %v4740_v57, %v4741_v56  ;;  %v4728_v1 = vunpack.c.h.bf16 %v3935_v61  ;;  %v4723_v3 = vunpack.c.l.bf16 %v3938_v62  ;;  %v4075_v56 = vld [vmem:[%s3804_s30 + $0xe0] sm:$0xff]   ;;  %v4095_v51 = vld [vmem:[%s3804_s30 + $0xf0] sm:$0xff]  }
  0x28   : > { %v3517_v2 = vpack.i.bf16 %v4734_v60, %v4735_v59  ;;  %v4722_v4 = vunpack.c.h.bf16 %v3938_v62  ;;  %v4719_v22 = vunpack.c.l.bf16 %v3955_v5  ;;  %v4718_v23 = vunpack.c.h.bf16 %v3955_v5  ;;  %v4055_v59 = vld [vmem:[%s3804_s30 + $0xd0] sm:$0xff]  }
  0x29   : > { %3473 = vrot.lane.b32.xlu0 %v3472_v31, %s3693_s9  ;;  %v3522_v20 = vpack.i.bf16 %v4728_v1, %v4729_v0  ;;  %v4721_v31 = vunpack.c.l.bf16 %v3958_v6  ;;  %v4035_v0 = vld [vmem:[%s3804_s30 + $0xc0] sm:$0xff]   ;;  %v4753_v52 = vunpack.c.h.bf16 %v4075_v56 }
  0x2a   : > { %3478 = vrot.lane.b32.xlu1 %v3477_v34, %s3693_s9  ;;  %v3527_v26 = vpack.i.bf16 %v4722_v4, %v4723_v3  ;;  %v4720_v34 = vunpack.c.h.bf16 %v3958_v6  ;;  %v4015_v3 = vld [vmem:[%s3804_s30 + $0xb0] sm:$0xff]  }
  0x2d   : > { %3483 = vrot.lane.b32.xlu0 %v3482_v39, %s3693_s9  ;;  %v3975_v39 = vld [vmem:[%s3804_s30 + $0x90] sm:$0xff]  }
  0x2e   : > { %3488 = vrot.lane.b32.xlu1 %v3487_v42, %s3693_s9  ;;  %v3978_v42 = vld [vmem:[%s3804_s30 + $0x98] sm:$0xff]  }
  0x31   : > { %3493 = vrot.lane.b32.xlu0 %v3492_v47, %s3693_s9  ;;  %v3532_v47 = vpack.i.bf16 %v4718_v23, %v4719_v22  ;;  %v3998_v23 = vld [vmem:[%s3804_s30 + $0xa8] sm:$0xff]  }
  0x32   : > { %3498 = vrot.lane.b32.xlu1 %v3497_v50, %s3693_s9  ;;  %v4725_v50 = vunpack.c.l.bf16 %v3975_v39  ;;  %v4732_v4 = vunpack.c.h.bf16 %v3998_v23 }
  0x35   : > { %3503 = vrot.lane.b32.xlu0 %v3502_v55, %s3693_s9  ;;  %v4724_v55 = vunpack.c.h.bf16 %v3975_v39 }
  0x36   : > { %3508 = vrot.lane.b32.xlu1 %v3507_v58, %s3693_s9  ;;  %v3537_v58 = vpack.i.bf16 %v4720_v34, %v4721_v31 }
  0x39   : > { %3513 = vrot.lane.b32.xlu0 %v3512_v63, %s3693_s9  ;;  %v4727_v63 = vunpack.c.l.bf16 %v3978_v42 }
  0x3a   : > { %3518 = vrot.lane.b32.xlu1 %v3517_v2, %s3693_s9  ;;  %v4726_v2 = vunpack.c.h.bf16 %v3978_v42 }
  0x3c   : > { %v3547_v31 = vpack.i.bf16 %v4726_v2, %v4727_v63  ;;  %v4736_v2 = vunpack.c.h.bf16 %v4015_v3 }
  0x3d   : > { %3523 = vrot.lane.b32.xlu0 %v3522_v20, %s3693_s9  ;;  %v3995_v20 = vld [vmem:[%s3804_s30 + $0xa0] sm:$0xff]  }
  0x3e   : > { %3528 = vrot.lane.b32.xlu1 %v3527_v26, %s3693_s9  ;;  %v3542_v26 = vpack.i.bf16 %v4724_v55, %v4725_v50  ;;  %v4731_v22 = vunpack.c.l.bf16 %v3995_v20  ;;  %v4730_v34 = vunpack.c.h.bf16 %v3995_v20  ;;  %v4018_v55 = vld [vmem:[%s3804_s30 + $0xb8] sm:$0xff]   ;;  %v4737_v50 = vunpack.c.l.bf16 %v4015_v3 }
  0x3f   : > { %v4738_v1 = vunpack.c.h.bf16 %v4018_v55 }
  0x41   : > { %3533 = vrot.lane.b32.xlu0 %v3532_v47, %s3693_s9  ;;  %v4733_v47 = vunpack.c.l.bf16 %v3998_v23 }
  0x42   : > { %3538 = vrot.lane.b32.xlu1 %v3537_v58, %s3693_s9  ;;  %v3552_v58 = vpack.i.bf16 %v4730_v34, %v4731_v22  ;;  %v4038_v34 = vld [vmem:[%s3804_s30 + $0xc8] sm:$0xff]   ;;  %v4743_v22 = vunpack.c.l.bf16 %v4035_v0 }
  0x43   : > { %v3557_v63 = vpack.i.bf16 %v4732_v4, %v4733_v47  ;;  %v4742_v4 = vunpack.c.h.bf16 %v4035_v0  ;;  %v4745_v60 = vunpack.c.h.bf16 %v4038_v34 }
  0x45   : > { %3543 = vrot.lane.b32.xlu0 %v3542_v26, %s3693_s9  ;;  %v4739_v26 = vunpack.c.l.bf16 %v4018_v55 }
  0x46   : > { %3548 = vrot.lane.b32.xlu1 %v3547_v31, %s3693_s9  ;;  %v3562_v31 = vpack.i.bf16 %v4736_v2, %v4737_v50  ;;  %v4058_v2 = vld [vmem:[%s3804_s30 + $0xd8] sm:$0xff]   ;;  %v4750_v50 = vunpack.c.l.bf16 %v4055_v59 }
  0x47   : > { %v3567_v47 = vpack.i.bf16 %v4738_v1, %v4739_v26  ;;  %v4749_v1 = vunpack.c.h.bf16 %v4055_v59  ;;  %v4751_v57 = vunpack.c.h.bf16 %v4058_v2 }
  0x49   : > { %3553 = vrot.lane.b32.xlu0 %v3552_v58, %s3693_s9  ;;  %v4746_v58 = vunpack.c.l.bf16 %v4038_v34 }
  0x4a   : > { %3558 = vrot.lane.b32.xlu1 %v3557_v63, %s3693_s9  ;;  %v3572_v63 = vpack.i.bf16 %v4742_v4, %v4743_v22  ;;  %v4078_v4 = vld [vmem:[%s3804_s30 + $0xe8] sm:$0xff]   ;;  %v4756_v22 = vunpack.c.l.bf16 %v4075_v56 }
  0x4b   : > { %v3577_v26 = vpack.i.bf16 %v4745_v60, %v4746_v58  ;;  %v4755_v58 = vunpack.c.l.bf16 %v4078_v4 }
  0x4d   : > { %3563 = vrot.lane.b32.xlu0 %v3562_v31, %s3693_s9  ;;  %v4752_v31 = vunpack.c.l.bf16 %v4058_v2 }
  0x4e   : > { %3568 = vrot.lane.b32.xlu1 %v3567_v47, %s3693_s9  ;;  %v3582_v47 = vpack.i.bf16 %v4749_v1, %v4750_v50  ;;  %v4760_v1 = vunpack.c.l.bf16 %v4095_v51  ;;  %v4757_v50 = vunpack.c.h.bf16 %v4095_v51 }
  0x4f   : > { %v3587_v60 = vpack.i.bf16 %v4751_v57, %v4752_v31  ;;  %v4759_v31 = vunpack.c.l.bf16 %v4098_v49 }
  0x51   : > { %3573 = vrot.lane.b32.xlu0 %v3572_v63, %s3693_s9  ;;  %v4754_v63 = vunpack.c.h.bf16 %v4078_v4 }
  0x52   : > { %3578 = vrot.lane.b32.xlu1 %v3577_v26, %s3693_s9  ;;  %v3592_v26 = vpack.i.bf16 %v4753_v52, %v4756_v22  ;;  %v3602_v52 = vpack.i.bf16 %v4757_v50, %v4760_v1  ;;  %v1382_v50 = vld [vmem:[%s4713_s3] sm:$0xff] }
  0x53   : > { %v3597_v57 = vpack.i.bf16 %v4754_v63, %v4755_v58 }
  0x55   : > { %3583 = vrot.lane.b32.xlu0 %v3582_v47, %s3693_s9  ;;  %v4758_v47 = vunpack.c.h.bf16 %v4098_v49 }
  0x56   : > { %3588 = vrot.lane.b32.xlu1 %v3587_v60, %s3693_s9 }
  0x57   : > { %v3607_v60 = vpack.i.bf16 %v4758_v47, %v4759_v31 }
  0x59   : > { %3593 = vrot.lane.b32.xlu0 %v3592_v26, %s3693_s9 }
  0x5a   : > { %3598 = vrot.lane.b32.xlu1 %v3597_v57, %s3693_s9  ;;  %v1383_v57 = vld [vmem:[%s4713_s3 + $0x8] sm:$0xff] }
  0x5b   : > { %v3306_v31 = vpack.c.bf16 %v1383_v57, %v1382_v50 }
  0x5d   : > { %3603 = vrot.lane.b32.xlu0 %v3602_v52, %s3693_s9  ;;  %3307 = vmatprep.subr.bf16.mxu1 %v3306_v31 }
  0x5e   : > { %3608 = vrot.lane.b32.xlu1 %v3607_v60, %s3693_s9  ;;  %3309 = vmatpush3.bf16.msra.mxu1 %v3306_v31  ;;  %s272_s9 = sand.u32 1, %s3683_s27  }
  0x5f   : > { %s2518_s10 = sshll.u32 %s272_s9, 2  ;;  %s2441_s20 = scalar_lea.sflag [#allocation4], %s272_s9 }
  0x60   : > { %s274_s15 = scalar_lea.vmem [#allocation3], %s2518_s10 }
  0x61   : > { %s2455_s16 = sshll.u32 %s274_s15, 4  ;;  %s4670_s16 = int_to_ptr.vmem [resolvable:$true] %s2455_s16 }
  0x62   : > { %s3629_s21 = scalar_lea.vmem %s4670_s16, 64  ;;  %p3636_p0 = scmp.lt.s32.totalorder %s4670_s16, %s3634_s23 }
  0x63   : > { %p3630_p11 = scmp.ne.s32.totalorder %s4670_s16, %s3629_s21  ;;  %p3637_p1 = scmp.lt.s32.totalorder %s3635_s24, %s3629_s21 }
  0x65   : > { %p3631_p12 = pnand %p3630_p11, %p3775_p5  ;;  %p3638_p2 = por %p3637_p1, %p3636_p0 }
  0x67   : > { %p3632_p13 = pneg %p3631_p12 }
  0x69   : > { %p3639_p3 = pnand %p3638_p2, %p3632_p13 }
  0x93   : > { %v3454_v63 = vpop.permute.xlu0 %3453 }
  0x94   : > { %v3456_v58 = vunpack.i.h.bf16 %v3454_v63  ;;  %v3455_v22 = vunpack.i.l.bf16 %v3454_v63  ;;  %v3464_v26 = vpop.permute.xlu1 %3463 }
  0x95   : > { %v3465_v60 = vunpack.i.l.bf16 %v3464_v26  ;;  %v3466_v43 = vunpack.i.h.bf16 %v3464_v26 }
  0x96   : > { %v666_v47 = vmul.f32 %v3456_v58, %v2730_v11  ;;  %v665_v52 = vmul.f32 %v3455_v22, %v2729_v10 }
  0x97   : > { %v3459_v1 = vpop.permute.xlu0 %3458  ;;  %v669_v10 = vmul.f32 %v3465_v60, %v2737_v15  ;;  %v4767_v60 = vunpack.c.h.bf16 %v3875_v37 }
  0x98   : > { %v3461_v63 = vunpack.i.h.bf16 %v3459_v1  ;;  %v3460_v48 = vunpack.i.l.bf16 %v3459_v1  ;;  %3098 = vmatprep.mubr.msk.f32.mxu0 %vm740_vm0, %v665_v52  ;;  %v3469_v44 = vpop.permute.xlu1 %3468  ;;  %v670_v1 = vmul.f32 %v3466_v43, %v2738_v16 }
  0x99   : > { %3099 = vmatmul.mubr.msk.f32.vlgmr.msra.gmra.mrb[0].mxu0 %vm740_vm0, %v666_v47  ;;  %v3470_v11 = vunpack.i.l.bf16 %v3469_v44  ;;  %v3471_v50 = vunpack.i.h.bf16 %v3469_v44 }
  0x9a   : > { %v668_v41 = vmul.f32 %v3461_v63, %v2734_v13  ;;  %v667_v7 = vmul.f32 %v3460_v48, %v2733_v12 }
  0x9b   : > { %v3474_v22 = vpop.permute.xlu0 %3473  ;;  %v671_v58 = vmul.f32 %v3470_v11, %v2741_v17  ;;  %v672_v13 = vmul.f32 %v3471_v50, %v2742_v18  ;;  %v4769_v11 = vunpack.c.h.bf16 %v3878_v38 }
  0x9c   : > { %3101 = vmatprep.mubr.msk.f32.mxu0 %vm740_vm0, %v667_v7  ;;  %v3475_v8 = vunpack.i.l.bf16 %v3474_v22  ;;  %v3479_v12 = vpop.permute.xlu1 %3478  ;;  %v3476_v15 = vunpack.i.h.bf16 %v3474_v22  ;;  %v4768_v7 = vunpack.c.l.bf16 %v3878_v38 }
  0x9d   : > { %3102 = vmatmul.mubr.msk.f32.gmra.mrb[2].mxu0 %vm740_vm0, %v668_v41  ;;  %v3480_v16 = vunpack.i.l.bf16 %v3479_v12  ;;  %v3481_v43 = vunpack.i.h.bf16 %v3479_v12 }
  0x9e   : > { %3104 = vmatprep.mubr.msk.f32.mxu0 %vm740_vm0, %v669_v10  ;;  %v673_v9 = vmul.f32 %v3475_v8, %v2745_v24  ;;  %v674_v17 = vmul.f32 %v3476_v15, %v2746_v25  ;;  %v4771_v8 = vunpack.c.h.bf16 %v3895_v45  ;;  %v4772_v15 = vunpack.c.l.bf16 %v3898_v46 }
  0x9f   : > { %v3484_v41 = vpop.permute.xlu0 %3483  ;;  %v675_v14 = vmul.f32 %v3480_v16, %v2749_v27  ;;  %v676_v24 = vmul.f32 %v3481_v43, %v2750_v28 }
  0xa0   : > { %v3485_v18 = vunpack.i.l.bf16 %v3484_v41  ;;  %v3489_v44 = vpop.permute.xlu1 %3488  ;;  %v3486_v48 = vunpack.i.h.bf16 %v3484_v41  ;;  %v4773_v41 = vunpack.c.h.bf16 %v3898_v46 }
  0xa1   : > { %3105 = vmatmul.mubr.msk.f32.gmra.mrb[4].mxu0 %vm740_vm0, %v670_v1  ;;  %v3490_v25 = vunpack.i.l.bf16 %v3489_v44  ;;  %v3491_v47 = vunpack.i.h.bf16 %v3489_v44  ;;  %v4770_v1 = vunpack.c.l.bf16 %v3895_v45 }
  0xa2   : > { %3107 = vmatprep.mubr.msk.f32.mxu0 %vm740_vm0, %v671_v58  ;;  %v677_v19 = vmul.f32 %v3485_v18, %v2753_v32  ;;  %v678_v27 = vmul.f32 %v3486_v48, %v2754_v33 }
  0xa3   : > { %v3494_v31 = vpop.permute.xlu0 %3493  ;;  %v679_v21 = vmul.f32 %v3490_v25, %v2757_v35  ;;  %v680_v32 = vmul.f32 %v3491_v47, %v2758_v36  ;;  %v4776_v25 = vunpack.c.l.bf16 %v3918_v54  ;;  %v4777_v47 = vunpack.c.h.bf16 %v3918_v54 }
  0xa4   : > { %v3495_v28 = vunpack.i.l.bf16 %v3494_v31  ;;  %v3499_v26 = vpop.permute.xlu1 %3498  ;;  %v3496_v57 = vunpack.i.h.bf16 %v3494_v31 }
  0xa5   : > { %3108 = vmatmul.mubr.msk.f32.gmra.mrb[6].mxu0 %vm740_vm0, %v672_v13  ;;  %v3500_v33 = vunpack.i.l.bf16 %v3499_v26  ;;  %v3501_v63 = vunpack.i.h.bf16 %v3499_v26  ;;  %v4778_v26 = vunpack.c.l.bf16 %v3935_v61 }
  0xa6   : > { %3110 = vmatprep.mubr.msk.f32.mxu0 %vm740_vm0, %v673_v9  ;;  %v681_v29 = vmul.f32 %v3495_v28, %v2761_v40  ;;  %v682_v35 = vmul.f32 %v3496_v57, %v4767_v60  ;;  %v4780_v60 = vunpack.c.l.bf16 %v3938_v62 }
  0xa7   : > { %v3504_v52 = vpop.permute.xlu0 %3503  ;;  %v683_v30 = vmul.f32 %v3500_v33, %v4768_v7  ;;  %v684_v40 = vmul.f32 %v3501_v63, %v4769_v11  ;;  %v4781_v7 = vunpack.c.h.bf16 %v3938_v62 }
  0xa8   : > { %v3505_v36 = vunpack.i.l.bf16 %v3504_v52  ;;  %v3509_v10 = vpop.permute.xlu1 %3508  ;;  %v3506_v22 = vunpack.i.h.bf16 %v3504_v52 }
  0xa9   : > { %3111 = vmatmul.mubr.msk.f32.gmra.mrb[8].mxu0 %vm740_vm0, %v674_v17  ;;  %v3510_v50 = vunpack.i.l.bf16 %v3509_v10  ;;  %v3511_v13 = vunpack.i.h.bf16 %v3509_v10  ;;  %v4782_v10 = vunpack.c.l.bf16 %v3955_v5 }
  0xaa   : > { %3113 = vmatprep.mubr.msk.f32.mxu0 %vm740_vm0, %v675_v14  ;;  %v685_v37 = vmul.f32 %v3505_v36, %v4770_v1  ;;  %v686_v12 = vmul.f32 %v3506_v22, %v4771_v8  ;;  %v4774_v14 = vunpack.c.l.bf16 %v3915_v53  ;;  %v4783_v22 = vunpack.c.h.bf16 %v3955_v5 }
  0xab   : > { %v3514_v58 = vpop.permute.xlu0 %3513  ;;  %v687_v38 = vmul.f32 %v3510_v50, %v4772_v15  ;;  %v688_v17 = vmul.f32 %v3511_v13, %v4773_v41  ;;  %v4784_v50 = vunpack.c.l.bf16 %v3958_v6  ;;  %v4787_v41 = vunpack.c.h.bf16 %v3975_v39 }
  0xac   : > { %v3515_v9 = vunpack.i.l.bf16 %v3514_v58  ;;  %v3519_v16 = vpop.permute.xlu1 %3518  ;;  %v3516_v43 = vunpack.i.h.bf16 %v3514_v58 }
  0xad   : > { %3114 = vmatmul.mubr.msk.f32.gmra.mrb[10].mxu0 %vm740_vm0, %v676_v24  ;;  %v3520_v18 = vunpack.i.l.bf16 %v3519_v16  ;;  %v4775_v24 = vunpack.c.h.bf16 %v3915_v53 }
  0xae   : > { %3116 = vmatprep.mubr.msk.f32.mxu0 %vm740_vm0, %v677_v19  ;;  %v689_v45 = vmul.f32 %v3515_v9, %v4774_v14  ;;  %v3521_v19 = vunpack.i.h.bf16 %v3519_v16  ;;  %v4788_v14 = vunpack.c.l.bf16 %v3978_v42 }
  0xaf   : > { %v3524_v44 = vpop.permute.xlu0 %3523  ;;  %v690_v48 = vmul.f32 %v3516_v43, %v4775_v24  ;;  %v691_v46 = vmul.f32 %v3520_v18, %v4776_v25 }
  0xb0   : > { %v3525_v31 = vunpack.i.l.bf16 %v3524_v44  ;;  %v3526_v28 = vunpack.i.h.bf16 %v3524_v44  ;;  %v4789_v44 = vunpack.c.h.bf16 %v3978_v42 }
  0xb1   : > { %3117 = vmatmul.mubr.msk.f32.gmra.mrb[12].mxu0 %vm740_vm0, %v678_v27  ;;  %v3529_v27 = vpop.permute.xlu1 %3528 }
  0xb2   : > { %3119 = vmatprep.mubr.msk.f32.mxu0 %vm740_vm0, %v679_v21  ;;  %v692_v21 = vmul.f32 %v3521_v19, %v4777_v47  ;;  %v693_v53 = vmul.f32 %v3525_v31, %v4778_v26  ;;  %v3531_v52 = vunpack.i.h.bf16 %v3529_v27  ;;  %v4790_v19 = vunpack.c.l.bf16 %v3995_v20 }
  0xb3   : > { %v3534_v57 = vpop.permute.xlu0 %3533  ;;  %v4791_v31 = vunpack.c.h.bf16 %v3995_v20 }
  0xb4   : > { %v3536_v36 = vunpack.i.h.bf16 %v3534_v57 }
  0xb5   : > { %3120 = vmatmul.mubr.msk.f32.gmra.mrb[14].mxu0 %vm740_vm0, %v680_v32  ;;  %v3530_v32 = vunpack.i.l.bf16 %v3529_v27  ;;  %v3539_v63 = vpop.permute.xlu1 %3538 }
  0xb6   : > { %3122 = vmatprep.mubr.msk.f32.mxu0 %vm740_vm0, %v681_v29  ;;  %v4779_v29 = vunpack.c.h.bf16 %v3935_v61  ;;  %v3540_v11 = vunpack.i.l.bf16 %v3539_v63  ;;  %v698_v1 = vmul.f32 %v3536_v36, %v4783_v22  ;;  %v4798_v22 = vunpack.c.l.bf16 %v4035_v0 }
  0xb7   : > { %v695_v54 = vmul.f32 %v3530_v32, %v4780_v60  ;;  %v1384_v60 = vld [vmem:[%s4713_s3 + $0x10] sm:$0xff] }
  0xb8   : > { %v694_v33 = vmul.f32 %v3526_v28, %v4779_v29  ;;  %v699_v62 = vmul.f32 %v3540_v11, %v4784_v50  ;;  %v4794_v29 = vunpack.c.l.bf16 %v4015_v3  ;;  %v4797_v11 = vunpack.c.h.bf16 %v4018_v55 }
  0xb9   : > { %3123 = vmatmul.mubr.msk.f32.gmra.mrb[16].mxu0 %vm740_vm0, %v682_v35  ;;  %v3535_v35 = vunpack.i.l.bf16 %v3534_v57  ;;  %v3549_v8 = vpop.permute.xlu1 %3548 }
  0xba   : > { %3125 = vmatprep.mubr.msk.f32.mxu0 %vm740_vm0, %v683_v30  ;;  %v696_v30 = vmul.f32 %v3531_v52, %v4781_v7  ;;  %v3550_v9 = vunpack.i.l.bf16 %v3549_v8  ;;  %v3551_v43 = vunpack.i.h.bf16 %v3549_v8 }
  0xbb   : > { %v697_v61 = vmul.f32 %v3535_v35, %v4782_v10 }
  0xbc   : > { %v704_v24 = vmul.f32 %v3551_v43, %v4789_v44  ;;  %v4803_v43 = vunpack.c.h.bf16 %v4055_v59 }
  0xbd   : > { %3126 = vmatmul.mubr.msk.f32.gmra.mrb[18].mxu0 %vm740_vm0, %v684_v40  ;;  %v3544_v40 = vpop.permute.xlu0 %3543  ;;  %v3559_v18 = vpop.permute.xlu1 %3558 }
  0xbe   : > { %3128 = vmatprep.mubr.msk.f32.mxu0 %vm740_vm0, %v685_v37  ;;  %v3541_v37 = vunpack.i.h.bf16 %v3539_v63  ;;  %v3545_v58 = vunpack.i.l.bf16 %v3544_v40  ;;  %v3546_v15 = vunpack.i.h.bf16 %v3544_v40  ;;  %v3560_v25 = vunpack.i.l.bf16 %v3559_v18 }
  0xbf   : > { %v3561_v47 = vunpack.i.h.bf16 %v3559_v18 }
  0xc1   : > { %3129 = vmatmul.mubr.msk.f32.gmra.mrb[20].mxu0 %vm740_vm0, %v686_v12  ;;  %v4785_v12 = vunpack.c.h.bf16 %v3958_v6  ;;  %v3554_v16 = vpop.permute.xlu0 %3553  ;;  %v703_v6 = vmul.f32 %v3550_v9, %v4788_v14  ;;  %v3569_v26 = vpop.permute.xlu1 %3568 }
  0xc2   : > { %3131 = vmatprep.mubr.msk.f32.mxu0 %vm740_vm0, %v687_v38  ;;  %v4786_v38 = vunpack.c.l.bf16 %v3975_v39  ;;  %v3571_v63 = vunpack.i.h.bf16 %v3569_v26 }
  0xc3   : > { %v700_v13 = vmul.f32 %v3541_v37, %v4785_v12 }
  0xc4   : > { %v701_v5 = vmul.f32 %v3545_v58, %v4786_v38  ;;  %v712_v40 = vmul.f32 %v3571_v63, %v4797_v11  ;;  %v4801_v38 = vunpack.c.h.bf16 %v4038_v34 }
  0xc5   : > { %3132 = vmatmul.mubr.msk.f32.gmra.mrb[22].mxu0 %vm740_vm0, %v688_v17  ;;  %v702_v17 = vmul.f32 %v3546_v15, %v4787_v41 }
  0xc6   : > { %3134 = vmatprep.mubr.msk.f32.mxu0 %vm740_vm0, %v689_v45  ;;  %v3555_v45 = vunpack.i.l.bf16 %v3554_v16 }
  0xc8   : > { %v705_v39 = vmul.f32 %v3555_v45, %v4790_v19  ;;  %v4804_v45 = vunpack.c.l.bf16 %v4058_v2 }
  0xc9   : > { %3135 = vmatmul.mubr.msk.f32.gmra.mrb[24].mxu0 %vm740_vm0, %v690_v48  ;;  %v3556_v48 = vunpack.i.h.bf16 %v3554_v16 }
  0xca   : > { %3137 = vmatprep.mubr.msk.f32.mxu0 %vm740_vm0, %v691_v46  ;;  %v3564_v46 = vpop.permute.xlu0 %3563 }
  0xcb   : > { %v706_v27 = vmul.f32 %v3556_v48, %v4791_v31  ;;  %v3565_v28 = vunpack.i.l.bf16 %v3564_v46  ;;  %v3566_v57 = vunpack.i.h.bf16 %v3564_v46  ;;  %v4807_v31 = vunpack.c.h.bf16 %v4075_v56 }
  0xcd   : > { %3138 = vmatmul.mubr.msk.f32.gmra.mrb[26].mxu0 %vm740_vm0, %v692_v21  ;;  %v4792_v21 = vunpack.c.l.bf16 %v3998_v23  ;;  %v709_v20 = vmul.f32 %v3565_v28, %v4794_v29 }
  0xce   : > { %3140 = vmatprep.mubr.msk.f32.mxu0 %vm740_vm0, %v693_v53  ;;  %v4793_v53 = vunpack.c.h.bf16 %v3998_v23  ;;  %v3574_v52 = vpop.permute.xlu0 %3573  ;;  %v4795_v23 = vunpack.c.h.bf16 %v4015_v3 }
  0xcf   : > { %v707_v42 = vmul.f32 %v3560_v25, %v4792_v21  ;;  %v3575_v10 = vunpack.i.l.bf16 %v3574_v52  ;;  %v3576_v3 = vunpack.i.h.bf16 %v3574_v52  ;;  %v4808_v21 = vunpack.c.l.bf16 %v4078_v4 }
  0xd0   : > { %v708_v32 = vmul.f32 %v3561_v47, %v4793_v53  ;;  %v710_v35 = vmul.f32 %v3566_v57, %v4795_v23  ;;  %v4810_v57 = vunpack.c.l.bf16 %v4095_v51 }
  0xd1   : > { %3141 = vmatmul.mubr.msk.f32.gmra.mrb[28].mxu0 %vm740_vm0, %v694_v33  ;;  %v3570_v33 = vunpack.i.l.bf16 %v3569_v26  ;;  %v4809_v26 = vunpack.c.h.bf16 %v4078_v4  ;;  %v4813_v4 = vunpack.c.h.bf16 %v4098_v49 }
  0xd2   : > { %3143 = vmatprep.mubr.msk.f32.mxu0 %vm740_vm0, %v695_v54  ;;  %v1385_v54 = vld [vmem:[%s4713_s3 + $0x18] sm:$0xff]  ;;  %v3584_v50 = vpop.permute.xlu0 %3583 }
  0xd3   : > { %v3310_v7 = vpack.c.bf16 %v1385_v54, %v1384_v60  ;;  %v3586_v9 = vunpack.i.h.bf16 %v3584_v50  ;;  %v4812_v60 = vunpack.c.l.bf16 %v4098_v49 }
  0xd5   : > { %3144 = vmatmul.mubr.msk.f32.gmra.mrb[30].mxu0 %vm740_vm0, %v696_v30  ;;  %v4796_v30 = vunpack.c.l.bf16 %v4018_v55  ;;  %3311 = vmatprep.subr.bf16.mxu1 %v3310_v7  ;;  %v4800_v55 = vunpack.c.l.bf16 %v4038_v34  ;;  %v718_v14 = vmul.f32 %v3586_v9, %v4803_v43 }
  0xd6   : > { %3146 = vmatprep.mubr.msk.f32.mxu0 %vm740_vm0, %v697_v61  ;;  %v3579_v61 = vpop.permute.xlu1 %3578  ;;  %3313 = vmatpush3.bf16.msra.mxu1 %v3310_v7 }
  0xd7   : > { %v711_v36 = vmul.f32 %v3570_v33, %v4796_v30  ;;  %v3580_v37 = vunpack.i.l.bf16 %v3579_v61  ;;  %v3581_v8 = vunpack.i.h.bf16 %v3579_v61 }
  0xd9   : > { %3147 = vmatmul.mubr.msk.f32.gmra.mrb[32].mxu0 %vm740_vm0, %v698_v1  ;;  %v713_v1 = vmul.f32 %v3575_v10, %v4798_v22  ;;  %v715_v12 = vmul.f32 %v3580_v37, %v4800_v55 }
  0xda   : > { %3149 = vmatprep.mubr.msk.f32.mxu0 %vm740_vm0, %v699_v62  ;;  %v4799_v62 = vunpack.c.h.bf16 %v4035_v0  ;;  %v3589_v15 = vpop.permute.xlu1 %3588  ;;  %v4802_v0 = vunpack.c.l.bf16 %v4055_v59 }
  0xdb   : > { %v3590_v41 = vunpack.i.l.bf16 %v3589_v15 }
  0xdc   : > { %v714_v58 = vmul.f32 %v3576_v3, %v4799_v62 }
  0xdd   : > { %3150 = vmatmul.mubr.msk.f32.gmra.mrb[34].mxu0 %vm740_vm0, %v700_v13  ;;  %v3585_v13 = vunpack.i.l.bf16 %v3584_v50  ;;  %v719_v34 = vmul.f32 %v3590_v41, %v4804_v45 }
  0xde   : > { %3152 = vmatprep.mubr.msk.f32.mxu0 %vm740_vm0, %v701_v5  ;;  %v716_v5 = vmul.f32 %v3581_v8, %v4801_v38  ;;  %v3599_v44 = vpop.permute.xlu1 %3598 }
  0xdf   : > { %v717_v16 = vmul.f32 %v3585_v13, %v4802_v0  ;;  %v3600_v25 = vunpack.i.l.bf16 %v3599_v44  ;;  %v3601_v47 = vunpack.i.h.bf16 %v3599_v44 }
  0xe1   : > { %3153 = vmatmul.mubr.msk.f32.gmra.mrb[36].mxu0 %vm740_vm0, %v702_v17  ;;  %v3594_v17 = vpop.permute.xlu0 %3593  ;;  %v724_v53 = vmul.f32 %v3601_v47, %v4809_v26 }
  0xe2   : > { %3155 = vmatprep.mubr.msk.f32.mxu0 %vm740_vm0, %v703_v6  ;;  %v3591_v6 = vunpack.i.h.bf16 %v3589_v15  ;;  %v3595_v18 = vunpack.i.l.bf16 %v3594_v17  ;;  %v3596_v19 = vunpack.i.h.bf16 %v3594_v17  ;;  %v3609_v28 = vpop.permute.xlu1 %3608 }
  0xe3   : > { %v3610_v29 = vunpack.i.l.bf16 %v3609_v28  ;;  %v3611_v52 = vunpack.i.h.bf16 %v3609_v28 }
  0xe5   : > { %3156 = vmatmul.mubr.msk.f32.gmra.mrb[38].mxu0 %vm740_vm0, %v704_v24  ;;  %v4805_v24 = vunpack.c.h.bf16 %v4058_v2  ;;  %v3604_v46 = vpop.permute.xlu0 %3603  ;;  %v723_v2 = vmul.f32 %v3600_v25, %v4808_v21  ;;  %v727_v54 = vmul.f32 %v3610_v29, %v4812_v60  ;;  %v728_v23 = vmul.f32 %v3611_v52, %v4813_v4 }
  0xe6   : > { %3158 = vmatprep.mubr.msk.f32.mxu0 %vm740_vm0, %v705_v39  ;;  %v4806_v39 = vunpack.c.l.bf16 %v4075_v56 }
  0xe7   : > { %v720_v48 = vmul.f32 %v3591_v6, %v4805_v24 }
  0xe8   : > { %v721_v59 = vmul.f32 %v3595_v18, %v4806_v39 }
  0xe9   : > { %3159 = vmatmul.mubr.msk.f32.gmra.mrb[40].mxu0 %vm740_vm0, %v706_v27  ;;  %v722_v27 = vmul.f32 %v3596_v19, %v4807_v31 }
  0xea   : > { %3161 = vmatprep.mubr.msk.f32.mxu0 %vm740_vm0, %v707_v42  ;;  %v3605_v42 = vunpack.i.l.bf16 %v3604_v46 }
  0xec   : > { %v725_v56 = vmul.f32 %v3605_v42, %v4810_v57 }
  0xed   : > { %3162 = vmatmul.mubr.msk.f32.gmra.mrb[42].mxu0 %vm740_vm0, %v708_v32  ;;  %v3606_v32 = vunpack.i.h.bf16 %v3604_v46 }
  0xee   : > { %3164 = vmatprep.mubr.msk.f32.mxu0 %vm740_vm0, %v709_v20  ;;  %v4811_v20 = vunpack.c.h.bf16 %v4095_v51  ;;  %v4333_v51 = vld [vmem:[%s4712_s2] ss:$0 sm:$0xff] }
  0xf0   : > { %v726_v33 = vmul.f32 %v3606_v32, %v4811_v20 }
  0xf1   : > { %3165 = vmatmul.mubr.msk.f32.gmra.mrb[44].mxu0 %vm740_vm0, %v710_v35 }
  0xf2   : > { %3167 = vmatprep.mubr.msk.f32.mxu0 %vm740_vm0, %v711_v36 }
  0xf5   : > { %3168 = vmatmul.mubr.msk.f32.gmra.mrb[46].mxu0 %vm740_vm0, %v712_v40 }
  0xf6   : > { %3170 = vmatprep.mubr.msk.f32.mxu0 %vm740_vm0, %v713_v1 }
  0xf9   : > { %3171 = vmatmul.mubr.msk.f32.gmra.mrb[48].mxu0 %vm740_vm0, %v714_v58 }
  0xfa   : > { %3173 = vmatprep.mubr.msk.f32.mxu0 %vm740_vm0, %v715_v12 }
  0xfd   : > { %3174 = vmatmul.mubr.msk.f32.gmra.mrb[50].mxu0 %vm740_vm0, %v716_v5 }
  0xfe   : > { %3176 = vmatprep.mubr.msk.f32.mxu0 %vm740_vm0, %v717_v16 }
 0x101   : > { %3177 = vmatmul.mubr.msk.f32.gmra.mrb[52].mxu0 %vm740_vm0, %v718_v14 }
 0x102   : > { %3179 = vmatprep.mubr.msk.f32.mxu0 %vm740_vm0, %v719_v34 }
 0x105   : > { %3180 = vmatmul.mubr.msk.f32.gmra.mrb[54].mxu0 %vm740_vm0, %v720_v48 }
 0x106   : > { %3182 = vmatprep.mubr.msk.f32.mxu0 %vm740_vm0, %v721_v59 }
 0x109   : > { %3183 = vmatmul.mubr.msk.f32.gmra.mrb[56].mxu0 %vm740_vm0, %v722_v27 }
 0x10a   : > { %3185 = vmatprep.mubr.msk.f32.mxu0 %vm740_vm0, %v723_v2 }
 0x10d   : > { %3186 = vmatmul.mubr.msk.f32.gmra.mrb[58].mxu0 %vm740_vm0, %v724_v53 }
 0x10e   : > { %3188 = vmatprep.mubr.msk.f32.mxu0 %vm740_vm0, %v725_v56 }
 0x111   : > { %3189 = vmatmul.mubr.msk.f32.gmra.mrb[60].mxu0 %vm740_vm0, %v726_v33 }
 0x112   : > { %3191 = vmatprep.mubr.msk.f32.mxu0 %vm740_vm0, %v727_v54 }
 0x115   : > { %3192 = vmatmul.mubr.msk.f32.gmra.mrb[62].mxu0 %vm740_vm0, %v728_v23 }
 0x16c   : > { %v3100_v35 = vpop.f32.mrb[0].mxu0 }
 0x16d   : > { %v1005_v63 = vadd.f32 %v3100_v35, %v4333_v51  ;;  %v999_v7 = vpop.f32.mrb[1].mxu0 }
 0x16e   : > { %v1000_v30 = vadd.f32 %v4333_v51, %v999_v7 }
 0x16f   : > { %v1319_v61 = vmax.f32 %v1005_v63, 0.0 }
 0x170   : > { %v1318_v36 = vmax.f32 %v1000_v30, 0.0  ;;  %v3103_v10 = vpop.f32.mrb[2].mxu0 }
 0x171   : > { %v1015_v49 = vadd.f32 %v3103_v10, %v4333_v51  ;;  %v1009_v11 = vpop.f32.mrb[3].mxu0 }
 0x172   : > { %v1010_v40 = vadd.f32 %v4333_v51, %v1009_v11  ;;  %3202 = vmatprep.mubr.msk.f32.mxu1 %vm740_vm0, %v1318_v36 }
 0x173   : > { %3203 = vmatmul.mubr.msk.f32.vlgmr.msra.gmra.mrb[0].mxu1 %vm740_vm0, %v1319_v61  ;;  %v1321_v1 = vmax.f32 %v1015_v49, 0.0 }
 0x174   : > { %v1320_v3 = vmax.f32 %v1010_v40, 0.0  ;;  %v3106_v22 = vpop.f32.mrb[4].mxu0 }
 0x175   : > { %v1025_v37 = vadd.f32 %v3106_v22, %v4333_v51  ;;  %v1019_v50 = vpop.f32.mrb[5].mxu0 }
 0x176   : > { %v1020_v62 = vadd.f32 %v4333_v51, %v1019_v50  ;;  %3205 = vmatprep.mubr.msk.f32.mxu1 %vm740_vm0, %v1320_v3 }
 0x177   : > { %3206 = vmatmul.mubr.msk.f32.gmra.mrb[2].mxu1 %vm740_vm0, %v1321_v1  ;;  %v1323_v55 = vmax.f32 %v1025_v37, 0.0 }
 0x178   : > { %v1322_v58 = vmax.f32 %v1020_v62, 0.0  ;;  %v3109_v8 = vpop.f32.mrb[6].mxu0 }
 0x179   : > { %v1035_v12 = vadd.f32 %v3109_v8, %v4333_v51  ;;  %v1029_v13 = vpop.f32.mrb[7].mxu0 }
 0x17a   : > { %v1030_v15 = vadd.f32 %v4333_v51, %v1029_v13  ;;  %3208 = vmatprep.mubr.msk.f32.mxu1 %vm740_vm0, %v1322_v58 }
 0x17b   : > { %3209 = vmatmul.mubr.msk.f32.gmra.mrb[4].mxu1 %vm740_vm0, %v1323_v55  ;;  %v1325_v9 = vmax.f32 %v1035_v12, 0.0 }
 0x17c   : > { %v1324_v38 = vmax.f32 %v1030_v15, 0.0  ;;  %v3112_v5 = vpop.f32.mrb[8].mxu0 }
 0x17d   : > { %v1045_v0 = vadd.f32 %v3112_v5, %v4333_v51  ;;  %v1039_v16 = vpop.f32.mrb[9].mxu0 }
 0x17e   : > { %v1040_v41 = vadd.f32 %v4333_v51, %v1039_v16  ;;  %3211 = vmatprep.mubr.msk.f32.mxu1 %vm740_vm0, %v1324_v38 }
 0x17f   : > { %3212 = vmatmul.mubr.msk.f32.gmra.mrb[6].mxu1 %vm740_vm0, %v1325_v9  ;;  %v1327_v14 = vmax.f32 %v1045_v0, 0.0 }
 0x180   : > { %v1326_v17 = vmax.f32 %v1040_v41, 0.0  ;;  %v3115_v43 = vpop.f32.mrb[10].mxu0 }
 0x181   : > { %v1055_v6 = vadd.f32 %v3115_v43, %v4333_v51  ;;  %v1049_v45 = vpop.f32.mrb[11].mxu0 }
 0x182   : > { %v1050_v34 = vadd.f32 %v4333_v51, %v1049_v45  ;;  %3214 = vmatprep.mubr.msk.f32.mxu1 %vm740_vm0, %v1326_v17 }
 0x183   : > { %3215 = vmatmul.mubr.msk.f32.gmra.mrb[8].mxu1 %vm740_vm0, %v1327_v14  ;;  %v1329_v24 = vmax.f32 %v1055_v6, 0.0 }
 0x184   : > { %v1328_v18 = vmax.f32 %v1050_v34, 0.0  ;;  %v3118_v44 = vpop.f32.mrb[12].mxu0 }
 0x185   : > { %v1065_v48 = vadd.f32 %v3118_v44, %v4333_v51  ;;  %v1059_v19 = vpop.f32.mrb[13].mxu0 }
 0x186   : > { %v1060_v39 = vadd.f32 %v4333_v51, %v1059_v19  ;;  %3217 = vmatprep.mubr.msk.f32.mxu1 %vm740_vm0, %v1328_v18 }
 0x187   : > { %3218 = vmatmul.mubr.msk.f32.gmra.mrb[10].mxu1 %vm740_vm0, %v1329_v24  ;;  %v1331_v46 = vmax.f32 %v1065_v48, 0.0 }
 0x188   : > { %v1330_v59 = vmax.f32 %v1060_v39, 0.0  ;;  %v3121_v25 = vpop.f32.mrb[14].mxu0 }
 0x189   : > { %v1075_v31 = vadd.f32 %v3121_v25, %v4333_v51  ;;  %v1069_v27 = vpop.f32.mrb[15].mxu0 }
 0x18a   : > { %v1070_v47 = vadd.f32 %v4333_v51, %v1069_v27  ;;  %3220 = vmatprep.mubr.msk.f32.mxu1 %vm740_vm0, %v1330_v59 }
 0x18b   : > { %3221 = vmatmul.mubr.msk.f32.gmra.mrb[12].mxu1 %vm740_vm0, %v1331_v46  ;;  %v1333_v42 = vmax.f32 %v1075_v31, 0.0 }
 0x18c   : > { %v1332_v21 = vmax.f32 %v1070_v47, 0.0  ;;  %v3124_v2 = vpop.f32.mrb[16].mxu0 }
 0x18d   : > { %v1085_v28 = vadd.f32 %v3124_v2, %v4333_v51  ;;  %v1079_v26 = vpop.f32.mrb[17].mxu0 }
 0x18e   : > { %v1080_v53 = vadd.f32 %v4333_v51, %v1079_v26  ;;  %3223 = vmatprep.mubr.msk.f32.mxu1 %vm740_vm0, %v1332_v21 }
 0x18f   : > { %3224 = vmatmul.mubr.msk.f32.gmra.mrb[14].mxu1 %vm740_vm0, %v1333_v42  ;;  %v1335_v56 = vmax.f32 %v1085_v28, 0.0 }
 0x190   : > { %v1334_v32 = vmax.f32 %v1080_v53, 0.0  ;;  %v3127_v57 = vpop.f32.mrb[18].mxu0 }
 0x191   : > { %v1095_v29 = vadd.f32 %v3127_v57, %v4333_v51  ;;  %v1089_v20 = vpop.f32.mrb[19].mxu0 }
 0x192   : > { %v1090_v33 = vadd.f32 %v4333_v51, %v1089_v20  ;;  %3226 = vmatprep.mubr.msk.f32.mxu1 %vm740_vm0, %v1334_v32 }
 0x193   : > { %3227 = vmatmul.mubr.msk.f32.gmra.mrb[16].mxu1 %vm740_vm0, %v1335_v56  ;;  %v1337_v54 = vmax.f32 %v1095_v29, 0.0 }
 0x194   : > { %v1336_v52 = vmax.f32 %v1090_v33, 0.0  ;;  %v3130_v60 = vpop.f32.mrb[20].mxu0 }
 0x195   : > { %v1105_v4 = vadd.f32 %v3130_v60, %v4333_v51  ;;  %v1099_v23 = vpop.f32.mrb[21].mxu0 }
 0x196   : > { %v1100_v35 = vadd.f32 %v4333_v51, %v1099_v23  ;;  %3229 = vmatprep.mubr.msk.f32.mxu1 %vm740_vm0, %v1336_v52 }
 0x197   : > { %3230 = vmatmul.mubr.msk.f32.gmra.mrb[18].mxu1 %vm740_vm0, %v1337_v54  ;;  %v1339_v30 = vmax.f32 %v1105_v4, 0.0 }
 0x198   : > { %v1338_v63 = vmax.f32 %v1100_v35, 0.0  ;;  %v3133_v7 = vpop.f32.mrb[22].mxu0 }
 0x199   : > { %v1115_v36 = vadd.f32 %v3133_v7, %v4333_v51  ;;  %v1109_v10 = vpop.f32.mrb[23].mxu0 }
 0x19a   : > { %v1110_v61 = vadd.f32 %v4333_v51, %v1109_v10  ;;  %3232 = vmatprep.mubr.msk.f32.mxu1 %vm740_vm0, %v1338_v63 }
 0x19b   : > { %3233 = vmatmul.mubr.msk.f32.gmra.mrb[20].mxu1 %vm740_vm0, %v1339_v30  ;;  %v1341_v40 = vmax.f32 %v1115_v36, 0.0 }
 0x19c   : > { %v1340_v49 = vmax.f32 %v1110_v61, 0.0  ;;  %v3136_v11 = vpop.f32.mrb[24].mxu0 }
 0x19d   : > { %v1125_v3 = vadd.f32 %v3136_v11, %v4333_v51  ;;  %v1119_v22 = vpop.f32.mrb[25].mxu0 }
 0x19e   : > { %v1120_v1 = vadd.f32 %v4333_v51, %v1119_v22  ;;  %3235 = vmatprep.mubr.msk.f32.mxu1 %vm740_vm0, %v1340_v49 }
 0x19f   : > { %3236 = vmatmul.mubr.msk.f32.gmra.mrb[22].mxu1 %vm740_vm0, %v1341_v40  ;;  %v1343_v62 = vmax.f32 %v1125_v3, 0.0 }
 0x1a0   : > { %v1342_v37 = vmax.f32 %v1120_v1, 0.0  ;;  %v3139_v50 = vpop.f32.mrb[26].mxu0 }
 0x1a1   : > { %v1135_v58 = vadd.f32 %v3139_v50, %v4333_v51  ;;  %v1129_v8 = vpop.f32.mrb[27].mxu0 }
 0x1a2   : > { %v1130_v55 = vadd.f32 %v4333_v51, %v1129_v8  ;;  %3238 = vmatprep.mubr.msk.f32.mxu1 %vm740_vm0, %v1342_v37 }
 0x1a3   : > { %3239 = vmatmul.mubr.msk.f32.gmra.mrb[24].mxu1 %vm740_vm0, %v1343_v62  ;;  %v1345_v15 = vmax.f32 %v1135_v58, 0.0 }
 0x1a4   : > { %v1344_v12 = vmax.f32 %v1130_v55, 0.0  ;;  %v3142_v13 = vpop.f32.mrb[28].mxu0 }
 0x1a5   : > { %v1145_v38 = vadd.f32 %v3142_v13, %v4333_v51  ;;  %v1139_v5 = vpop.f32.mrb[29].mxu0 }
 0x1a6   : > { %v1140_v9 = vadd.f32 %v4333_v51, %v1139_v5  ;;  %3241 = vmatprep.mubr.msk.f32.mxu1 %vm740_vm0, %v1344_v12 }
 0x1a7   : > { %3242 = vmatmul.mubr.msk.f32.gmra.mrb[26].mxu1 %vm740_vm0, %v1345_v15  ;;  %v1347_v41 = vmax.f32 %v1145_v38, 0.0 }
 0x1a8   : > { %v1346_v0 = vmax.f32 %v1140_v9, 0.0  ;;  %v3145_v16 = vpop.f32.mrb[30].mxu0 }
 0x1a9   : > { %v1155_v17 = vadd.f32 %v3145_v16, %v4333_v51  ;;  %v1149_v43 = vpop.f32.mrb[31].mxu0 }
 0x1aa   : > { %v1150_v14 = vadd.f32 %v4333_v51, %v1149_v43  ;;  %3244 = vmatprep.mubr.msk.f32.mxu1 %vm740_vm0, %v1346_v0 }
 0x1ab   : > { %3245 = vmatmul.mubr.msk.f32.gmra.mrb[28].mxu1 %vm740_vm0, %v1347_v41  ;;  %v1349_v34 = vmax.f32 %v1155_v17, 0.0 }
 0x1ac   : > { %v1348_v6 = vmax.f32 %v1150_v14, 0.0  ;;  %v3148_v45 = vpop.f32.mrb[32].mxu0 }
 0x1ad   : > { %v1165_v18 = vadd.f32 %v3148_v45, %v4333_v51  ;;  %v1159_v44 = vpop.f32.mrb[33].mxu0 }
 0x1ae   : > { %v1160_v24 = vadd.f32 %v4333_v51, %v1159_v44  ;;  %3247 = vmatprep.mubr.msk.f32.mxu1 %vm740_vm0, %v1348_v6 }
 0x1af   : > { %3248 = vmatmul.mubr.msk.f32.gmra.mrb[30].mxu1 %vm740_vm0, %v1349_v34  ;;  %v1351_v39 = vmax.f32 %v1165_v18, 0.0 }
 0x1b0   : > { %v1350_v48 = vmax.f32 %v1160_v24, 0.0  ;;  %v3151_v19 = vpop.f32.mrb[34].mxu0 }
 0x1b1   : > { %v1175_v59 = vadd.f32 %v3151_v19, %v4333_v51  ;;  %v1169_v25 = vpop.f32.mrb[35].mxu0 }
 0x1b2   : > { %v1170_v46 = vadd.f32 %v4333_v51, %v1169_v25  ;;  %3250 = vmatprep.mubr.msk.f32.mxu1 %vm740_vm0, %v1350_v48 }
 0x1b3   : > { %3251 = vmatmul.mubr.msk.f32.gmra.mrb[32].mxu1 %vm740_vm0, %v1351_v39  ;;  %v1353_v47 = vmax.f32 %v1175_v59, 0.0 }
 0x1b4   : > { %v1352_v31 = vmax.f32 %v1170_v46, 0.0  ;;  %v3154_v27 = vpop.f32.mrb[36].mxu0 }
 0x1b5   : > { %v1185_v21 = vadd.f32 %v3154_v27, %v4333_v51  ;;  %v1179_v2 = vpop.f32.mrb[37].mxu0 }
 0x1b6   : > { %v1180_v42 = vadd.f32 %v4333_v51, %v1179_v2  ;;  %3253 = vmatprep.mubr.msk.f32.mxu1 %vm740_vm0, %v1352_v31 }
 0x1b7   : > { %3254 = vmatmul.mubr.msk.f32.gmra.mrb[34].mxu1 %vm740_vm0, %v1353_v47  ;;  %v1355_v53 = vmax.f32 %v1185_v21, 0.0 }
 0x1b8   : > { %v1354_v28 = vmax.f32 %v1180_v42, 0.0  ;;  %v3157_v26 = vpop.f32.mrb[38].mxu0 }
 0x1b9   : > { %v1195_v32 = vadd.f32 %v3157_v26, %v4333_v51  ;;  %v1189_v57 = vpop.f32.mrb[39].mxu0 }
 0x1ba   : > { %v1190_v56 = vadd.f32 %v4333_v51, %v1189_v57  ;;  %3256 = vmatprep.mubr.msk.f32.mxu1 %vm740_vm0, %v1354_v28 }
 0x1bb   : > { %3257 = vmatmul.mubr.msk.f32.gmra.mrb[36].mxu1 %vm740_vm0, %v1355_v53  ;;  %v1357_v33 = vmax.f32 %v1195_v32, 0.0 }
 0x1bc   : > { %v1356_v29 = vmax.f32 %v1190_v56, 0.0  ;;  %v3160_v20 = vpop.f32.mrb[40].mxu0 }
 0x1bd   : > { %v1205_v52 = vadd.f32 %v3160_v20, %v4333_v51  ;;  %v1199_v60 = vpop.f32.mrb[41].mxu0 }
 0x1be   : > { %v1200_v54 = vadd.f32 %v4333_v51, %v1199_v60  ;;  %3259 = vmatprep.mubr.msk.f32.mxu1 %vm740_vm0, %v1356_v29 }
 0x1bf   : > { %3260 = vmatmul.mubr.msk.f32.gmra.mrb[38].mxu1 %vm740_vm0, %v1357_v33  ;;  %v1359_v35 = vmax.f32 %v1205_v52, 0.0 }
 0x1c0   : > { %v1358_v4 = vmax.f32 %v1200_v54, 0.0  ;;  %v3163_v23 = vpop.f32.mrb[42].mxu0 }
 0x1c1   : > { %v1215_v63 = vadd.f32 %v3163_v23, %v4333_v51  ;;  %v1209_v7 = vpop.f32.mrb[43].mxu0 }
 0x1c2   : > { %v1210_v30 = vadd.f32 %v4333_v51, %v1209_v7  ;;  %3262 = vmatprep.mubr.msk.f32.mxu1 %vm740_vm0, %v1358_v4 }
 0x1c3   : > { %3263 = vmatmul.mubr.msk.f32.gmra.mrb[40].mxu1 %vm740_vm0, %v1359_v35  ;;  %v1361_v61 = vmax.f32 %v1215_v63, 0.0 }
 0x1c4   : > { %v1360_v36 = vmax.f32 %v1210_v30, 0.0  ;;  %v3166_v10 = vpop.f32.mrb[44].mxu0  ;;  %v4466_v30 = vld [vmem:[%s4714_s4] ss:$0 sm:$0xff] }
 0x1c5   : > { %v1225_v49 = vadd.f32 %v3166_v10, %v4333_v51  ;;  %v1219_v11 = vpop.f32.mrb[45].mxu0 }
 0x1c6   : > { %v1220_v40 = vadd.f32 %v4333_v51, %v1219_v11  ;;  %3265 = vmatprep.mubr.msk.f32.mxu1 %vm740_vm0, %v1360_v36 }
 0x1c7   : > { %3266 = vmatmul.mubr.msk.f32.gmra.mrb[42].mxu1 %vm740_vm0, %v1361_v61  ;;  %v1363_v1 = vmax.f32 %v1225_v49, 0.0 }
 0x1c8   : > { %v1362_v3 = vmax.f32 %v1220_v40, 0.0  ;;  %v3169_v22 = vpop.f32.mrb[46].mxu0 }
 0x1c9   : > { %v1235_v37 = vadd.f32 %v3169_v22, %v4333_v51  ;;  %v1229_v50 = vpop.f32.mrb[47].mxu0 }
 0x1ca   : > { %v1230_v62 = vadd.f32 %v4333_v51, %v1229_v50  ;;  %3268 = vmatprep.mubr.msk.f32.mxu1 %vm740_vm0, %v1362_v3 }
 0x1cb   : > { %3269 = vmatmul.mubr.msk.f32.gmra.mrb[44].mxu1 %vm740_vm0, %v1363_v1  ;;  %v1365_v55 = vmax.f32 %v1235_v37, 0.0 }
 0x1cc   : > { %v1364_v58 = vmax.f32 %v1230_v62, 0.0  ;;  %v3172_v8 = vpop.f32.mrb[48].mxu0 }
 0x1cd   : > { %v1245_v12 = vadd.f32 %v3172_v8, %v4333_v51  ;;  %v1239_v13 = vpop.f32.mrb[49].mxu0 }
 0x1ce   : > { %v1240_v15 = vadd.f32 %v4333_v51, %v1239_v13  ;;  %3271 = vmatprep.mubr.msk.f32.mxu1 %vm740_vm0, %v1364_v58 }
 0x1cf   : > { %3272 = vmatmul.mubr.msk.f32.gmra.mrb[46].mxu1 %vm740_vm0, %v1365_v55  ;;  %v1367_v9 = vmax.f32 %v1245_v12, 0.0 }
 0x1d0   : > { %v1366_v38 = vmax.f32 %v1240_v15, 0.0  ;;  %v3175_v5 = vpop.f32.mrb[50].mxu0 }
 0x1d1   : > { %v1255_v0 = vadd.f32 %v3175_v5, %v4333_v51  ;;  %v1249_v16 = vpop.f32.mrb[51].mxu0 }
 0x1d2   : > { %3274 = vmatprep.mubr.msk.f32.mxu1 %vm740_vm0, %v1366_v38  ;;  %v1250_v41 = vadd.f32 %v4333_v51, %v1249_v16 }
 0x1d3   : > { %3275 = vmatmul.mubr.msk.f32.gmra.mrb[48].mxu1 %vm740_vm0, %v1367_v9  ;;  %v1369_v17 = vmax.f32 %v1255_v0, 0.0 }
 0x1d4   : > { %v1368_v43 = vmax.f32 %v1250_v41, 0.0  ;;  %v3178_v14 = vpop.f32.mrb[52].mxu0 }
 0x1d5   : > { %v1265_v6 = vadd.f32 %v3178_v14, %v4333_v51  ;;  %v1259_v45 = vpop.f32.mrb[53].mxu0 }
 0x1d6   : > { %3277 = vmatprep.mubr.msk.f32.mxu1 %vm740_vm0, %v1368_v43  ;;  %v1260_v34 = vadd.f32 %v4333_v51, %v1259_v45 }
 0x1d7   : > { %3278 = vmatmul.mubr.msk.f32.gmra.mrb[50].mxu1 %vm740_vm0, %v1369_v17  ;;  %v1371_v18 = vmax.f32 %v1265_v6, 0.0 }
 0x1d8   : > { %v1370_v44 = vmax.f32 %v1260_v34, 0.0  ;;  %v3181_v24 = vpop.f32.mrb[54].mxu0 }
 0x1d9   : > { %v1275_v48 = vadd.f32 %v3181_v24, %v4333_v51  ;;  %v1269_v19 = vpop.f32.mrb[55].mxu0 }
 0x1da   : > { %3280 = vmatprep.mubr.msk.f32.mxu1 %vm740_vm0, %v1370_v44  ;;  %v1270_v39 = vadd.f32 %v4333_v51, %v1269_v19 }
 0x1db   : > { %3281 = vmatmul.mubr.msk.f32.gmra.mrb[52].mxu1 %vm740_vm0, %v1371_v18  ;;  %v1373_v59 = vmax.f32 %v1275_v48, 0.0 }
 0x1dc   : > { %v1372_v25 = vmax.f32 %v1270_v39, 0.0  ;;  %v3184_v46 = vpop.f32.mrb[56].mxu0 }
 0x1dd   : > { %v1285_v31 = vadd.f32 %v3184_v46, %v4333_v51  ;;  %v1279_v27 = vpop.f32.mrb[57].mxu0 }
 0x1de   : > { %3283 = vmatprep.mubr.msk.f32.mxu1 %vm740_vm0, %v1372_v25  ;;  %v1280_v47 = vadd.f32 %v4333_v51, %v1279_v27 }
 0x1df   : > { %3284 = vmatmul.mubr.msk.f32.gmra.mrb[54].mxu1 %vm740_vm0, %v1373_v59  ;;  %v1375_v21 = vmax.f32 %v1285_v31, 0.0 }
 0x1e0   : > { %v1374_v2 = vmax.f32 %v1280_v47, 0.0  ;;  %v3187_v42 = vpop.f32.mrb[58].mxu0 }
 0x1e1   : > { %v1295_v28 = vadd.f32 %v3187_v42, %v4333_v51  ;;  %v1289_v26 = vpop.f32.mrb[59].mxu0 }
 0x1e2   : > { %3286 = vmatprep.mubr.msk.f32.mxu1 %vm740_vm0, %v1374_v2  ;;  %v1290_v53 = vadd.f32 %v4333_v51, %v1289_v26 }
 0x1e3   : > { %3287 = vmatmul.mubr.msk.f32.gmra.mrb[56].mxu1 %vm740_vm0, %v1375_v21  ;;  %v1377_v32 = vmax.f32 %v1295_v28, 0.0 }
 0x1e4   : > { %v1376_v57 = vmax.f32 %v1290_v53, 0.0  ;;  %v3190_v56 = vpop.f32.mrb[60].mxu0 }
 0x1e5   : > { %v1305_v29 = vadd.f32 %v3190_v56, %v4333_v51  ;;  %v1299_v20 = vpop.f32.mrb[61].mxu0 }
 0x1e6   : > { %3289 = vmatprep.mubr.msk.f32.mxu1 %vm740_vm0, %v1376_v57  ;;  %v1300_v33 = vadd.f32 %v4333_v51, %v1299_v20 }
 0x1e7   : > { %3290 = vmatmul.mubr.msk.f32.gmra.mrb[58].mxu1 %vm740_vm0, %v1377_v32  ;;  %v1379_v52 = vmax.f32 %v1305_v29, 0.0 }
 0x1e8   : > { %v1378_v60 = vmax.f32 %v1300_v33, 0.0  ;;  %v3193_v54 = vpop.f32.mrb[62].mxu0 }
 0x1e9   : > { %v1315_v4 = vadd.f32 %v3193_v54, %v4333_v51  ;;  %v1309_v23 = vpop.f32.mrb[63].mxu0 }
 0x1ea   : > { %3292 = vmatprep.mubr.msk.f32.mxu1 %vm740_vm0, %v1378_v60  ;;  %v1310_v35 = vadd.f32 %v4333_v51, %v1309_v23 }
 0x1eb   : > { %3293 = vmatmul.mubr.msk.f32.gmra.mrb[60].mxu1 %vm740_vm0, %v1379_v52  ;;  %v1381_v63 = vmax.f32 %v1315_v4, 0.0  ;;  %v4502_v4 = vld [vmem:[%s4715_s5] sm:$0x1] }
 0x1ec   : > { %v1380_v7 = vmax.f32 %v1310_v35, 0.0  ;;  %3054 = vmatprep.mubr.msk.f32.mxu0 %vm740_vm0, %v4502_v4 }
 0x1ee   : > { %3295 = vmatprep.mubr.msk.f32.mxu1 %vm740_vm0, %v1380_v7 }
 0x1ef   : > { %3296 = vmatmul.mubr.msk.f32.gmra.mrb[62].mxu1 %vm740_vm0, %v1381_v63 }
 0x1f0   : > { %3088 = vmatprep.mubr.msk.f32.mxu1 %vm740_vm0, %v4502_v4 }
 0x246   : > { %v3204_v36 = vpop.f32.mrb[0].mxu1 }
 0x247   : > { %v1657_v10 = vadd.f32 %v3204_v36, %v4466_v30  ;;  %v1651_v61 = vpop.f32.mrb[1].mxu1 }
 0x248   : > { %v1652_v49 = vadd.f32 %v4466_v30, %v1651_v61 }
 0x249   : > { %v1971_v51 = vmax.f32 %v1657_v10, 0.0 }
 0x24a   : > { %v1970_v11 = vmax.f32 %v1652_v49, 0.0  ;;  %v3207_v40 = vpop.f32.mrb[2].mxu1 }
 0x24b   : > { %v1667_v3 = vadd.f32 %v3207_v40, %v4466_v30  ;;  %v1661_v22 = vpop.f32.mrb[3].mxu1 }
 0x24c   : > { %v4471_v1 = vpack.c.bf16 %v1971_v51, %v1970_v11  ;;  %v1662_v37 = vadd.f32 %v4466_v30, %v1661_v22 }
 0x24d   : > { %v1973_v50 = vmax.f32 %v1667_v3, 0.0 }
 0x24e   : > { %v1972_v62 = vmax.f32 %v1662_v37, 0.0  ;;  %v3210_v58 = vpop.f32.mrb[4].mxu1  ;;  %v2035_v37 = vld [vmem:[#allocation2] sm:$0x1] }
 0x24f   : > { %v1677_v8 = vadd.f32 %v3210_v58, %v4466_v30  ;;  %v1671_v55 = vpop.f32.mrb[5].mxu1  ;;  %v3694_v58 = vmov 0  }
 0x250   : > { %v4475_v12 = vpack.c.bf16 %v1973_v50, %v1972_v62  ;;  %v1672_v13 = vadd.f32 %v4466_v30, %v1671_v55  ;;  %3612 = vset.pattern.permute.xlu0 %v3694_v58 }
 0x251   : > { %v1975_v15 = vmax.f32 %v1677_v8, 0.0  ;;  %2038 = vperm.xlu0 %3612, %v2035_v37  }
 0x252   : > { %v1974_v38 = vmax.f32 %v1672_v13, 0.0  ;;  %v3213_v5 = vpop.f32.mrb[6].mxu1 }
 0x253   : > { %v1687_v9 = vadd.f32 %v3213_v5, %v4466_v30  ;;  %v1681_v0 = vpop.f32.mrb[7].mxu1 }
 0x254   : > { %v4479_v16 = vpack.c.bf16 %v1975_v15, %v1974_v38  ;;  %v1682_v41 = vadd.f32 %v4466_v30, %v1681_v0 }
 0x255   : > { %v1977_v17 = vmax.f32 %v1687_v9, 0.0 }
 0x256   : > { %v1976_v43 = vmax.f32 %v1682_v41, 0.0  ;;  %v3216_v14 = vpop.f32.mrb[8].mxu1 }
 0x257   : > { %v1697_v6 = vadd.f32 %v3216_v14, %v4466_v30  ;;  %v1691_v45 = vpop.f32.mrb[9].mxu1 }
 0x258   : > { %v4483_v34 = vpack.c.bf16 %v1977_v17, %v1976_v43  ;;  %v1692_v18 = vadd.f32 %v4466_v30, %v1691_v45 }
 0x259   : > { %v1979_v44 = vmax.f32 %v1697_v6, 0.0 }
 0x25a   : > { %v1978_v24 = vmax.f32 %v1692_v18, 0.0  ;;  %v3219_v48 = vpop.f32.mrb[10].mxu1 }
 0x25b   : > { %v1707_v19 = vadd.f32 %v3219_v48, %v4466_v30  ;;  %v1701_v39 = vpop.f32.mrb[11].mxu1 }
 0x25c   : > { %v4487_v59 = vpack.c.bf16 %v1979_v44, %v1978_v24  ;;  %v1702_v25 = vadd.f32 %v4466_v30, %v1701_v39 }
 0x25d   : > { %v1981_v46 = vmax.f32 %v1707_v19, 0.0 }
 0x25e   : > { %v1980_v31 = vmax.f32 %v1702_v25, 0.0  ;;  %v3222_v27 = vpop.f32.mrb[12].mxu1 }
 0x25f   : > { %v1717_v47 = vadd.f32 %v3222_v27, %v4466_v30  ;;  %v1711_v21 = vpop.f32.mrb[13].mxu1 }
 0x260   : > { %v4491_v2 = vpack.c.bf16 %v1981_v46, %v1980_v31  ;;  %v1712_v42 = vadd.f32 %v4466_v30, %v1711_v21 }
 0x261   : > { %v1983_v28 = vmax.f32 %v1717_v47, 0.0 }
 0x262   : > { %v1982_v26 = vmax.f32 %v1712_v42, 0.0  ;;  %v3225_v53 = vpop.f32.mrb[14].mxu1 }
 0x263   : > { %v1727_v32 = vadd.f32 %v3225_v53, %v4466_v30  ;;  %v1721_v57 = vpop.f32.mrb[15].mxu1 }
 0x264   : > { %v4495_v56 = vpack.c.bf16 %v1983_v28, %v1982_v26  ;;  %v1722_v29 = vadd.f32 %v4466_v30, %v1721_v57 }
 0x265   : > { %v1985_v20 = vmax.f32 %v1727_v32, 0.0 }
 0x266   : > { %v1984_v33 = vmax.f32 %v1722_v29, 0.0  ;;  %v3228_v52 = vpop.f32.mrb[16].mxu1 }
 0x267   : > { %v1737_v60 = vadd.f32 %v3228_v52, %v4466_v30  ;;  %v1731_v54 = vpop.f32.mrb[17].mxu1 }
 0x268   : > { %v4504_v23 = vpack.c.bf16 %v1985_v20, %v1984_v33  ;;  %v1732_v35 = vadd.f32 %v4466_v30, %v1731_v54 }
 0x269   : > { %v1987_v63 = vmax.f32 %v1737_v60, 0.0 }
 0x26a   : > { %v1986_v7 = vmax.f32 %v1732_v35, 0.0  ;;  %v3231_v36 = vpop.f32.mrb[18].mxu1 }
 0x26b   : > { %v1747_v10 = vadd.f32 %v3231_v36, %v4466_v30  ;;  %v1741_v61 = vpop.f32.mrb[19].mxu1 }
 0x26c   : > { %v3314_v51 = vpack.c.bf16 %v1987_v63, %v1986_v7  ;;  %v1742_v11 = vadd.f32 %v4466_v30, %v1741_v61 }
 0x26d   : > { %v1989_v40 = vmax.f32 %v1747_v10, 0.0 }
 0x26e   : > { %v1988_v3 = vmax.f32 %v1742_v11, 0.0  ;;  %v3234_v22 = vpop.f32.mrb[20].mxu1  ;;  %3316 = vmatprep.subr.msk.bf16.mxu0 %vm4514_vm1, %v3314_v51 }
 0x26f   : > { %v1757_v50 = vadd.f32 %v3234_v22, %v4466_v30  ;;  %v1751_v62 = vpop.f32.mrb[21].mxu1  ;;  %3319 = vmatpush3.bf16.xpose.msk.msra.mxu0 %vm4514_vm1, %v4471_v1 }
 0x270   : > { %v3320_v8 = vpack.c.bf16 %v1989_v40, %v1988_v3  ;;  %v1752_v55 = vadd.f32 %v4466_v30, %v1751_v62 }
 0x271   : > { %v1991_v13 = vmax.f32 %v1757_v50, 0.0 }
 0x272   : > { %v1990_v15 = vmax.f32 %v1752_v55, 0.0  ;;  %v3237_v38 = vpop.f32.mrb[22].mxu1  ;;  %3322 = vmatprep.subr.msk.bf16.mxu0 %vm4514_vm1, %v3320_v8 }
 0x273   : > { %v1767_v5 = vadd.f32 %v3237_v38, %v4466_v30  ;;  %v1761_v9 = vpop.f32.mrb[23].mxu1 }
 0x274   : > { %v3326_v0 = vpack.c.bf16 %v1991_v13, %v1990_v15  ;;  %v1762_v41 = vadd.f32 %v4466_v30, %v1761_v9 }
 0x275   : > { %v1993_v17 = vmax.f32 %v1767_v5, 0.0 }
 0x276   : > { %v1992_v1 = vmax.f32 %v1762_v41, 0.0  ;;  %v3240_v43 = vpop.f32.mrb[24].mxu1 }
 0x277   : > { %v1777_v14 = vadd.f32 %v3240_v43, %v4466_v30  ;;  %v1771_v6 = vpop.f32.mrb[25].mxu1  ;;  %3325 = vmatpush3.bf16.xpose.msk.msra.mxu0 %vm4514_vm1, %v4475_v12 }
 0x278   : > { %v3332_v45 = vpack.c.bf16 %v1993_v17, %v1992_v1  ;;  %v1772_v18 = vadd.f32 %v4466_v30, %v1771_v6  ;;  %3328 = vmatprep.subr.msk.bf16.mxu0 %vm4514_vm1, %v3326_v0 }
 0x279   : > { %v1995_v44 = vmax.f32 %v1777_v14, 0.0 }
 0x27a   : > { %v1994_v24 = vmax.f32 %v1772_v18, 0.0  ;;  %v3243_v48 = vpop.f32.mrb[26].mxu1 }
 0x27b   : > { %v1787_v19 = vadd.f32 %v3243_v48, %v4466_v30  ;;  %v1781_v39 = vpop.f32.mrb[27].mxu1 }
 0x27c   : > { %v3338_v25 = vpack.c.bf16 %v1995_v44, %v1994_v24  ;;  %v1782_v46 = vadd.f32 %v4466_v30, %v1781_v39 }
 0x27d   : > { %v1997_v31 = vmax.f32 %v1787_v19, 0.0 }
 0x27e   : > { %v1996_v27 = vmax.f32 %v1782_v46, 0.0  ;;  %v3246_v47 = vpop.f32.mrb[28].mxu1 }
 0x27f   : > { %v1797_v12 = vadd.f32 %v3246_v47, %v4466_v30  ;;  %v1791_v21 = vpop.f32.mrb[29].mxu1  ;;  %3331 = vmatpush3.bf16.xpose.msk.msra.mxu0 %vm4514_vm1, %v4479_v16 }
 0x280   : > { %v3344_v42 = vpack.c.bf16 %v1997_v31, %v1996_v27  ;;  %v1792_v28 = vadd.f32 %v4466_v30, %v1791_v21  ;;  %3334 = vmatprep.subr.msk.bf16.mxu0 %vm4514_vm1, %v3332_v45 }
 0x281   : > { %v1999_v26 = vmax.f32 %v1797_v12, 0.0 }
 0x282   : > { %v1998_v53 = vmax.f32 %v1792_v28, 0.0  ;;  %v3249_v32 = vpop.f32.mrb[30].mxu1 }
 0x283   : > { %v1807_v57 = vadd.f32 %v3249_v32, %v4466_v30  ;;  %v1801_v29 = vpop.f32.mrb[31].mxu1 }
 0x284   : > { %v3350_v20 = vpack.c.bf16 %v1999_v26, %v1998_v53  ;;  %v1802_v33 = vadd.f32 %v4466_v30, %v1801_v29 }
 0x285   : > { %v2001_v52 = vmax.f32 %v1807_v57, 0.0 }
 0x286   : > { %v2000_v60 = vmax.f32 %v1802_v33, 0.0  ;;  %v3252_v54 = vpop.f32.mrb[32].mxu1 }
 0x287   : > { %v1817_v16 = vadd.f32 %v3252_v54, %v4466_v30  ;;  %v1811_v35 = vpop.f32.mrb[33].mxu1  ;;  %3337 = vmatpush3.bf16.xpose.msk.msra.mxu0 %vm4514_vm1, %v4483_v34 }
 0x288   : > { %v3356_v63 = vpack.c.bf16 %v2001_v52, %v2000_v60  ;;  %v1812_v7 = vadd.f32 %v4466_v30, %v1811_v35  ;;  %3340 = vmatprep.subr.msk.bf16.mxu0 %vm4514_vm1, %v3338_v25 }
 0x289   : > { %v2003_v36 = vmax.f32 %v1817_v16, 0.0 }
 0x28a   : > { %v2002_v10 = vmax.f32 %v1812_v7, 0.0  ;;  %v3255_v61 = vpop.f32.mrb[34].mxu1 }
 0x28b   : > { %v1827_v51 = vadd.f32 %v3255_v61, %v4466_v30  ;;  %v1821_v11 = vpop.f32.mrb[35].mxu1 }
 0x28c   : > { %v4556_v40 = vpack.c.bf16 %v2003_v36, %v2002_v10  ;;  %v1822_v3 = vadd.f32 %v4466_v30, %v1821_v11 }
 0x28d   : > { %v2005_v22 = vmax.f32 %v1827_v51, 0.0 }
 0x28e   : > { %v2004_v37 = vmax.f32 %v1822_v3, 0.0  ;;  %v3258_v50 = vpop.f32.mrb[36].mxu1 }
 0x28f   : > { %v1837_v34 = vadd.f32 %v3258_v50, %v4466_v30  ;;  %v1831_v62 = vpop.f32.mrb[37].mxu1  ;;  %3343 = vmatpush3.bf16.xpose.msk.msra.mxu0 %vm4514_vm1, %v4487_v59 }
 0x290   : > { %v4563_v58 = vpack.c.bf16 %v2005_v22, %v2004_v37  ;;  %v1832_v8 = vadd.f32 %v4466_v30, %v1831_v62  ;;  %3346 = vmatprep.subr.msk.bf16.mxu0 %vm4514_vm1, %v3344_v42 }
 0x291   : > { %v2007_v55 = vmax.f32 %v1837_v34, 0.0 }
 0x292   : > { %v2006_v13 = vmax.f32 %v1832_v8, 0.0  ;;  %v3261_v15 = vpop.f32.mrb[38].mxu1 }
 0x293   : > { %v1847_v38 = vadd.f32 %v3261_v15, %v4466_v30  ;;  %v1841_v5 = vpop.f32.mrb[39].mxu1 }
 0x294   : > { %v4569_v9 = vpack.c.bf16 %v2007_v55, %v2006_v13  ;;  %v1842_v0 = vadd.f32 %v4466_v30, %v1841_v5 }
 0x295   : > { %v2009_v41 = vmax.f32 %v1847_v38, 0.0 }
 0x296   : > { %v2008_v17 = vmax.f32 %v1842_v0, 0.0  ;;  %v3264_v59 = vpop.f32.mrb[40].mxu1 }
 0x297   : > { %v1857_v1 = vadd.f32 %v3264_v59, %v4466_v30  ;;  %v1851_v43 = vpop.f32.mrb[41].mxu1  ;;  %3349 = vmatpush3.bf16.xpose.msk.msra.mxu0 %vm4514_vm1, %v4491_v2 }
 0x298   : > { %v4576_v14 = vpack.c.bf16 %v2009_v41, %v2008_v17  ;;  %v1852_v6 = vadd.f32 %v4466_v30, %v1851_v43  ;;  %3352 = vmatprep.subr.msk.bf16.mxu0 %vm4514_vm1, %v3350_v20 }
 0x299   : > { %v2011_v45 = vmax.f32 %v1857_v1, 0.0 }
 0x29a   : > { %v2010_v18 = vmax.f32 %v1852_v6, 0.0  ;;  %v3267_v44 = vpop.f32.mrb[42].mxu1 }
 0x29b   : > { %v1867_v24 = vadd.f32 %v3267_v44, %v4466_v30  ;;  %v1861_v48 = vpop.f32.mrb[43].mxu1 }
 0x29c   : > { %v4582_v19 = vpack.c.bf16 %v2011_v45, %v2010_v18  ;;  %v1862_v39 = vadd.f32 %v4466_v30, %v1861_v48 }
 0x29d   : > { %v2013_v25 = vmax.f32 %v1867_v24, 0.0 }
 0x29e   : > { %v2012_v46 = vmax.f32 %v1862_v39, 0.0  ;;  %v3270_v2 = vpop.f32.mrb[44].mxu1 }
 0x29f   : > { %v1877_v31 = vadd.f32 %v3270_v2, %v4466_v30  ;;  %v1871_v27 = vpop.f32.mrb[45].mxu1  ;;  %3355 = vmatpush3.bf16.xpose.msk.msra.mxu0 %vm4514_vm1, %v4495_v56 }
 0x2a0   : > { %v4589_v47 = vpack.c.bf16 %v2013_v25, %v2012_v46  ;;  %v1872_v12 = vadd.f32 %v4466_v30, %v1871_v27  ;;  %3358 = vmatprep.subr.msk.bf16.mxu0 %vm4514_vm1, %v3356_v63 }
 0x2a1   : > { %v2015_v21 = vmax.f32 %v1877_v31, 0.0 }
 0x2a2   : > { %v2014_v42 = vmax.f32 %v1872_v12, 0.0  ;;  %v3273_v28 = vpop.f32.mrb[46].mxu1 }
 0x2a3   : > { %v1887_v26 = vadd.f32 %v3273_v28, %v4466_v30  ;;  %v1881_v53 = vpop.f32.mrb[47].mxu1 }
 0x2a4   : > { %v4595_v32 = vpack.c.bf16 %v2015_v21, %v2014_v42  ;;  %v1882_v57 = vadd.f32 %v4466_v30, %v1881_v53 }
 0x2a5   : > { %v2017_v29 = vmax.f32 %v1887_v26, 0.0 }
 0x2a6   : > { %v2016_v20 = vmax.f32 %v1882_v57, 0.0  ;;  %v3276_v56 = vpop.f32.mrb[48].mxu1 }
 0x2a7   : > { %v1897_v33 = vadd.f32 %v3276_v56, %v4466_v30  ;;  %v1891_v52 = vpop.f32.mrb[49].mxu1  ;;  %3361 = vmatpush3.bf16.xpose.msk.msra.mxu0 %vm4514_vm1, %v4504_v23 }
 0x2a8   : > { %v4602_v60 = vpack.c.bf16 %v2017_v29, %v2016_v20  ;;  %v1892_v54 = vadd.f32 %v4466_v30, %v1891_v52 }
 0x2a9   : > { %v2019_v16 = vmax.f32 %v1897_v33, 0.0 }
 0x2aa   : > { %v2018_v35 = vmax.f32 %v1892_v54, 0.0  ;;  %v3279_v63 = vpop.f32.mrb[50].mxu1 }
 0x2ab   : > { %v1907_v7 = vadd.f32 %v3279_v63, %v4466_v30  ;;  %v1901_v36 = vpop.f32.mrb[51].mxu1 }
 0x2ac   : > { %v3362_v10 = vpack.c.bf16 %v2019_v16, %v2018_v35  ;;  %v1902_v61 = vadd.f32 %v4466_v30, %v1901_v36 }
 0x2ad   : > { %v2021_v51 = vmax.f32 %v1907_v7, 0.0 }
 0x2ae   : > { %3364 = vmatprep.subr.msk.bf16.mxu1 %vm4514_vm1, %v3362_v10  ;;  %v2020_v11 = vmax.f32 %v1902_v61, 0.0  ;;  %v3282_v3 = vpop.f32.mrb[52].mxu1  ;;  %3055 = vmatmul.mubr.msk.f32.vlgmr.msra.gmra.mrb[64].mxu0 %vm740_vm0, %v4502_v4 }
 0x2af   : > { %3367 = vmatpush3.bf16.xpose.msk.msra.mxu1 %vm4514_vm1, %v4556_v40  ;;  %v1917_v23 = vadd.f32 %v3282_v3, %v4466_v30  ;;  %v1911_v22 = vpop.f32.mrb[53].mxu1 }
 0x2b0   : > { %v3368_v37 = vpack.c.bf16 %v2021_v51, %v2020_v11  ;;  %v1912_v50 = vadd.f32 %v4466_v30, %v1911_v22 }
 0x2b1   : > { %v2023_v34 = vmax.f32 %v1917_v23, 0.0 }
 0x2b2   : > { %3370 = vmatprep.subr.msk.bf16.mxu1 %vm4514_vm1, %v3368_v37  ;;  %v2022_v62 = vmax.f32 %v1912_v50, 0.0  ;;  %v3285_v8 = vpop.f32.mrb[54].mxu1 }
 0x2b3   : > { %v1927_v55 = vadd.f32 %v3285_v8, %v4466_v30  ;;  %v1921_v13 = vpop.f32.mrb[55].mxu1  ;;  %v3695_v8 = vmov 1966171168  }
 0x2b4   : > { %v3374_v15 = vpack.c.bf16 %v2023_v34, %v2022_v62  ;;  %v1922_v38 = vadd.f32 %v4466_v30, %v1921_v13 }
 0x2b5   : > { %v2025_v5 = vmax.f32 %v1927_v55, 0.0  ;;  %v2413_v55 = vunpack.c.l.s4 %v3695_v8 }
 0x2b6   : > { %v2024_v40 = vmax.f32 %v1922_v38, 0.0  ;;  %v3288_v0 = vpop.f32.mrb[56].mxu1 }
 0x2b7   : > { %3373 = vmatpush3.bf16.xpose.msk.msra.mxu1 %vm4514_vm1, %v4563_v58  ;;  %v1937_v41 = vadd.f32 %v3288_v0, %v4466_v30  ;;  %v1931_v17 = vpop.f32.mrb[57].mxu1  ;;  %v2414_v13 = vunpack.c.0.s8 %v2413_v55 }
 0x2b8   : > { %3376 = vmatprep.subr.msk.bf16.mxu1 %vm4514_vm1, %v3374_v15  ;;  %v3380_v59 = vpack.c.bf16 %v2025_v5, %v2024_v40  ;;  %v1932_v1 = vadd.f32 %v4466_v30, %v1931_v17 }
 0x2b9   : > { %v2027_v43 = vmax.f32 %v1937_v41, 0.0 }
 0x2ba   : > { %v2026_v6 = vmax.f32 %v1932_v1, 0.0  ;;  %v3291_v45 = vpop.f32.mrb[58].mxu1 }
 0x2bb   : > { %v1947_v18 = vadd.f32 %v3291_v45, %v4466_v30  ;;  %v1941_v44 = vpop.f32.mrb[59].mxu1 }
 0x2bc   : > { %v3386_v24 = vpack.c.bf16 %v2027_v43, %v2026_v6  ;;  %v1942_v48 = vadd.f32 %v4466_v30, %v1941_v44 }
 0x2bd   : > { %v2029_v39 = vmax.f32 %v1947_v18, 0.0 }
 0x2be   : > { %v2028_v58 = vmax.f32 %v1942_v48, 0.0  ;;  %v3294_v25 = vpop.f32.mrb[60].mxu1 }
 0x2bf   : > { %3379 = vmatpush3.bf16.xpose.msk.msra.mxu1 %vm4514_vm1, %v4569_v9  ;;  %v1957_v46 = vadd.f32 %v3294_v25, %v4466_v30  ;;  %v1951_v2 = vpop.f32.mrb[61].mxu1 }
 0x2c0   : > { %3382 = vmatprep.subr.msk.bf16.mxu1 %vm4514_vm1, %v3380_v59  ;;  %v3392_v31 = vpack.c.bf16 %v2029_v39, %v2028_v58  ;;  %v1952_v27 = vadd.f32 %v4466_v30, %v1951_v2 }
 0x2c1   : > { %v2031_v12 = vmax.f32 %v1957_v46, 0.0 }
 0x2c2   : > { %v2030_v21 = vmax.f32 %v1952_v27, 0.0  ;;  %v3297_v42 = vpop.f32.mrb[62].mxu1 }
 0x2c3   : > { %v1967_v28 = vadd.f32 %v3297_v42, %v4466_v30  ;;  %v1961_v26 = vpop.f32.mrb[63].mxu1 }
 0x2c4   : > { %v3398_v53 = vpack.c.bf16 %v2031_v12, %v2030_v21  ;;  %v1962_v57 = vadd.f32 %v4466_v30, %v1961_v26  ;;  %v2041_v30 = vlaneseq }
 0x2c5   : > { %v2033_v29 = vmax.f32 %v1967_v28, 0.0 }
 0x2c6   : > { %v2032_v9 = vmax.f32 %v1962_v57, 0.0  ;;  %vm2437_vm2 = vcmp.lt.s32.totalorder %v2041_v30, 512 }
 0x2c7   : > { %3385 = vmatpush3.bf16.xpose.msk.msra.mxu1 %vm4514_vm1, %v4576_v14  ;;  %v2042_v14 = vshrl.u32 %v2041_v30, 7 }
 0x2c8   : > { %3388 = vmatprep.subr.msk.bf16.mxu1 %vm4514_vm1, %v3386_v24  ;;  %v3404_v20 = vpack.c.bf16 %v2033_v29, %v2032_v9 }
 0x2c9   : > { %v2417_v15 = vsub.s32 %v2414_v13, %v2042_v14 }
 0x2cf   : > { %3391 = vmatpush3.bf16.xpose.msk.msra.mxu1 %vm4514_vm1, %v4582_v19  ;;  %v2043_v19 = vsub.s32 0, %v2042_v14 }
 0x2d0   : > { %3394 = vmatprep.subr.msk.bf16.mxu1 %vm4514_vm1, %v3392_v31 }
 0x2d7   : > { %3397 = vmatpush3.bf16.xpose.msk.msra.mxu1 %vm4514_vm1, %v4589_v47  ;;  %v2039_v47 = vpop.permute.xlu0 %2038 }
 0x2d8   : > { %3400 = vmatprep.subr.msk.bf16.mxu1 %vm4514_vm1, %v3398_v53  ;;  %v2044_v56 = vrot.slane %v2039_v47, %v2043_v19 }
 0x2df   : > { %3403 = vmatpush3.bf16.xpose.msk.msra.mxu1 %vm4514_vm1, %v4595_v32 }
 0x2e0   : > { %3406 = vmatprep.subr.msk.bf16.mxu1 %vm4514_vm1, %v3404_v20 }
 0x2e7   : > { %3409 = vmatpush3.bf16.xpose.msk.msra.mxu1 %vm4514_vm1, %v4602_v60 }
 0x2ee   : > { %3089 = vmatmul.mubr.msk.f32.vlgmr.msra.gmra.mrb[64].mxu1 %vm740_vm0, %v4502_v4 }
 0x381   : > { %v2306_v33 = vpop.f32.mrb[64].mxu0 }
 0x382   : > { %v2307_v52 = vadd.f32 %v2306_v33, %v2044_v56  ;;  %v2308_v54 = vpop.f32.mrb[65].mxu0 }
 0x383   : > { %v2309_v16 = vadd.f32 %v2308_v54, %v2044_v56 }
 0x384   : > { %v2717_v32 = vmul.f32 -1.442695, %v2307_v52 }
 0x385   : > { %v2718_v35 = vmul.f32 -1.442695, %v2309_v16 }
 0x386   : > { %3613 = vpow2.f32 %v2717_v32 }
 0x387   : > { %3615 = vpow2.f32 %v2718_v35 }
 0x390   : > { %v3614_v63 = vpop.eup %3613 }
 0x391   : > { %v3616_v7 = vpop.eup %3615  ;;  %v2394_v49 = vadd.f32 1.0, %v3614_v63 }
 0x392   : > { %v2395_v60 = vadd.f32 1.0, %v3616_v7 }
 0x393   : > { %3617 = vrcp.f32 %v2394_v49 }
 0x394   : > { %3619 = vrcp.f32 %v2395_v60 }
 0x39d   : > { %v3618_v4 = vpop.eup %3617 }
 0x39e   : > { %v3620_v36 = vpop.eup %3619 }
 0x39f   : > { %v2410_v10 = vcombine.low %v3618_v4, %v3620_v36 }
 0x3a1   : > { %v2418_v0 = vrot.slane %v2410_v10, %v2417_v15 }
 0x3c1   : > { %v2377_v61 = vpop.f32.mrb[64].mxu1 }
 0x3c2   : > { %v2378_v51 = vadd.f32 %v2377_v61, %v2044_v56  ;;  %v2379_v11 = vpop.f32.mrb[65].mxu1 }
 0x3c3   : > { %v2380_v3 = vadd.f32 %v2379_v11, %v2044_v56 }
 0x3c4   : > { %v2719_v23 = vmul.f32 -1.442695, %v2378_v51 }
 0x3c5   : > { %v2720_v22 = vmul.f32 -1.442695, %v2380_v3 }
 0x3c6   : > { %3621 = vpow2.f32 %v2719_v23 }
 0x3c7   : > { %3623 = vpow2.f32 %v2720_v22 }
 0x3d0   : > { %v3622_v37 = vpop.eup %3621 }
 0x3d1   : > { %v3624_v50 = vpop.eup %3623  ;;  %v2396_v34 = vadd.f32 1.0, %v3622_v37 }
 0x3d2   : > { %v2397_v62 = vadd.f32 1.0, %v3624_v50 }
 0x3d3   : > { %3625 = vrcp.f32 %v2396_v34 }
 0x3d4   : > { %3627 = vrcp.f32 %v2397_v62 }
 0x3dd   : > { %v3626_v38 = vpop.eup %3625 }
 0x3de   : > { %v3628_v5 = vpop.eup %3627 }
 0x3df   : > { %v2411_v40 = vcombine.low %v3626_v38, %v3628_v5 }
 0x3e1   : > { %v2425_v41 = vrot.slane %v2411_v40, %v2417_v15 }
 0x3e3   : > { %v2426_v17 = vcombine.low %v2418_v0, %v2425_v41 }
 0x3e5   : > { %v2433_v59 = vrot.slane %v2426_v17, %v2417_v15 }
 0x3e7   : > { %2439 = vst.msk [vmem:[%s274_s15] sm:$0xf] %vm2437_vm2, %v2433_v59 }
 0x3e8   : > { %3642 = shalt.err (!%p3639_p3)
}
 0x3e9   : > { %s3643_s14 = scalar_lea.hbm %s4668_s19, 64  ;;  %s3647_s30 = scalar_lea.hbm %s4717_s7, 128 }
 0x3ea   : > { %p3644_p4 = scmp.ne.s32.totalorder %s4668_s19, %s3643_s14  ;;  %p3648_p9 = scmp.lt.u32.totalorder %s4668_s19, %s4717_s7 }
 0x3eb   : > { %p3649_p10 = scmp.lt.u32.totalorder %s3647_s30, %s3643_s14  ;;  %p3651_p12 = scmp.lt.u32.totalorder %s3643_s14, %s4668_s19 }
 0x3ec   : > { %p3645_p7 = pnand %p3644_p4, %p3775_p5 }
 0x3ed   : > { %p3650_p11 = por %p3649_p10, %p3648_p9 }
 0x3ee   : > { %p3646_p8 = pneg %p3645_p7 }
 0x3ef   : > { %p3652_p13 = por %p3651_p12, %p3650_p11 }
 0x3f1   : > { %p3653_p0 = pnand %p3652_p13, %p3646_p8 }
 0x3f3   : > { %3656 = shalt.err (!%p3653_p0)
}
 0x3f4   : > { %3410 = dma.vmem_to_hbm [thread:$0]  (%p3775_p5), %s4670_s16, 64, %s4668_s19, %s2441_s20  }
 0x3f5 PF: > { %p3416_p1 = scmp.ge.s32.totalorder %s3691_s29, 2  ;;  %s2467_s15 = sand.u32 1, %s3679_s26  }
 0x3f6   : > { %s2468_s17 = scalar_lea.sflag [#allocation4], %s2467_s15 }
 0x3f7   : > { %p3413_p2 = pnand %p3416_p1, %p3779_p6 }
 0x3f9   : > { %3674 = dma.done.wait (!%p3413_p2), %s2468_s17, 64  }
 0x3fa   : > { %3676 = vsyncadd (!%p3413_p2), %s2468_s17, 4294967232  ;;  %p19_p3 = scmp.ge.s32.totalorder %s3763_s8, 4   ;;  %s4816_s26 = smov %s3683_s27 }
 0x3fb   : > { %s4817_s27 = smov %s3687_s28  ;;  %s4818_s28 = smov %s3773_s11 }
 0x3fc   : > { %s4819_s29 = smov %s3763_s8  ;;  %21 = sbr.rel (!%p19_p3) target bundleno = 6 (0x6), region = 83 }
 0x403   :  { %2473 = vsyncpa [#allocation4], 1 }
 0x404   :  { %2475 = vsyncpa [#allocation4 + $0x1], 1 }

</bundles_post_ra>
